<compile_context>
chip_gen: v6e
topology: v6e:2x2x1
jax: 0.10.0
libtpu: 0.0.40
codegen_flags: <defaults>
</compile_context>

<pallas_src>
import functools

import jax
import jax.numpy as jnp
from jax import lax
from jax.experimental import pallas as pl
from jax.experimental.pallas import tpu as pltpu


def dplstm_kernel(x_ref, w_ih_ref, w_hh_ref, b_ref, w_out_ref, b_out_ref,
                  out_ref, gx_ref, h_ref, c_ref, *, t_total):
    # x_ref:     (Tc, Bb, E)   bf16  time-major chunk of embedded input
    # w_ih_ref:  (E, 4Hp)      bf16
    # w_hh_ref:  (Hp, 4Hp)     bf16
    # b_ref:     (1, 4Hp)      f32   (b_ih + b_hh)
    # w_out_ref: (Hp, Op)      bf16
    # b_out_ref: (1, Op)       f32
    # out_ref:   (Bb, Op)      f32   (written on the last time chunk only)
    # gx_ref:    (Tc*Bb, 4Hp)  f32   scratch: hoisted input projection
    # h_ref/c_ref: (Bb, Hp)    f32   scratch: state carried across T chunks
    Tc, Bb, E = x_ref.shape
    Hp = w_hh_ref.shape[0]
    t_idx = pl.program_id(1)
    n_t = pl.num_programs(1)

    # Reset carried state at the start of each batch block's time sweep.
    @pl.when(t_idx == 0)
    def _():
        h_ref[...] = jnp.zeros_like(h_ref)
        c_ref[...] = jnp.zeros_like(c_ref)

    # Hoisted input projection for this chunk: one big MXU matmul.
    gx_ref[...] = jnp.dot(x_ref[...].reshape(Tc * Bb, E), w_ih_ref[...],
                          preferred_element_type=jnp.float32)

    bias = b_ref[...]                       # (1, 4Hp), tiny (4 vregs at Hp=128)
    needs_mask = (t_total % Tc) != 0        # static: only true for padded tail

    def sigmoid_eup(x):
        # sigmoid(x) = 0.5*(tanh(x/2)+1): one EUP tanh + cheap VPU mul/add.
        return 0.5 * jnp.tanh(0.5 * x) + 0.5

    def step(s, carry):
        h, c = carry                                            # (Bb, Hp) f32
        row = pl.multiple_of(s * Bb, Bb)
        gates = (gx_ref[pl.ds(row, Bb), :] + bias
                 + jnp.dot(h.astype(w_hh_ref.dtype), w_hh_ref[...],
                           preferred_element_type=jnp.float32))  # (Bb, 4Hp)
        # PyTorch / opacus DPLSTM gate order: [i, f, g, o]
        i_g = sigmoid_eup(gates[:, 0 * Hp:1 * Hp])
        f_g = sigmoid_eup(gates[:, 1 * Hp:2 * Hp])
        g_g = jnp.tanh(gates[:, 2 * Hp:3 * Hp])
        o_g = sigmoid_eup(gates[:, 3 * Hp:4 * Hp])
        c_new = f_g * c + i_g * g_g
        h_new = o_g * jnp.tanh(c_new)
        if needs_mask:  # padded timesteps (past the true T) leave state fixed
            valid = (t_idx * Tc + s) < t_total
            h_new = jnp.where(valid, h_new, h)
            c_new = jnp.where(valid, c_new, c)
        return h_new, c_new

    unroll = True if Tc <= 16 else 8
    h, c = lax.fori_loop(0, Tc, step, (h_ref[...], c_ref[...]), unroll=unroll)
    h_ref[...] = h
    c_ref[...] = c

    # Final Linear on the last hidden state (lane-dense store).
    @pl.when(t_idx == n_t - 1)
    def _():
        out_ref[...] = (jnp.dot(h.astype(w_out_ref.dtype), w_out_ref[...],
                                preferred_element_type=jnp.float32)
                        + b_out_ref[...])


def _round_up(x, m):
    return ((x + m - 1) // m) * m


def _pick_t_chunk(T, Bb, E, Hp, budget_bytes=12 * 1024 * 1024):
    # Per-timestep VMEM held in the chunk: double-buffered bf16 x + f32 gx.
    per_t = Bb * (2 * E * 2 + 4 * Hp * 4)
    return int(max(1, min(T, budget_bytes // max(per_t, 1))))


def _vmem_limit_bytes(Tc, Bb, E, Hp, Op):
    dbl = 2  # double buffering
    total = (dbl * Tc * Bb * E * 2                              # x block (bf16)
             + dbl * 2 * (E * 4 * Hp + Hp * 4 * Hp + Hp * Op)   # bf16 weights
             + dbl * 4 * (4 * Hp + Op)                          # f32 biases
             + dbl * Bb * Op * 4                                # out block
             + Tc * Bb * 4 * Hp * 4                             # gx scratch
             + 2 * Bb * Hp * 4)                                 # h/c scratch
    # Headroom for compiler temporaries; cap below v7x's 64 MiB physical VMEM.
    return int(min(max(total * 3 // 2 + (4 << 20), 16 << 20), 56 << 20))


def dplstm_forward(tokens, params, *, batch_block=32):
    """tokens: (B, T) int32 indices. Returns squeeze(Linear(last LSTM hidden))."""
    emb, w_ih, w_hh, b_ih, b_hh, w_out, b_out = (
        params["emb"], params["w_ih"], params["w_hh"], params["b_ih"],
        params["b_hh"], params["w_out"], params["b_out"])

    B, T = tokens.shape
    E = emb.shape[1]
    H = w_hh.shape[1]
    O = w_out.shape[0]

    Bb = min(_round_up(B, 8), _round_up(batch_block, 8))  # batch block (sublanes)
    Bp = _round_up(B, Bb)                                  # padded batch
    Hp = _round_up(H, 128)                                 # lane-aligned gates
    Op = _round_up(O, 128)                                 # lane-dense output
    Tc = _pick_t_chunk(T, Bb, E, Hp)
    Tp = _round_up(T, Tc)

    # Glue: embedding gather -> time-major -> pad; bf16 for the MXU.
    # TODO(synk): fuse the gather into the kernel via scalar-prefetched ids.
    x = jnp.take(emb, tokens, axis=0)                        # (B, T, E)
    x = jnp.transpose(x, (1, 0, 2))                          # (T, B, E)
    x = jnp.pad(x, ((0, Tp - T), (0, Bp - B), (0, 0))).astype(jnp.bfloat16)

    # Pad each gate block H->Hp (zero columns + zero bias keep padded h/c
    # lanes exactly 0) and orient all weights for right-matmuls.
    w_ih4 = jnp.pad(w_ih.reshape(4, H, E), ((0, 0), (0, Hp - H), (0, 0)))
    w_ih_t = jnp.transpose(w_ih4.reshape(4 * Hp, E)).astype(jnp.bfloat16)   # (E, 4Hp)

    w_hh4 = jnp.pad(w_hh.reshape(4, H, H), ((0, 0), (0, Hp - H), (0, Hp - H)))
    w_hh_t = jnp.transpose(w_hh4.reshape(4 * Hp, Hp)).astype(jnp.bfloat16)  # (Hp, 4Hp)

    b = jnp.pad((b_ih + b_hh).reshape(4, H), ((0, 0), (0, Hp - H)))
    b = b.reshape(1, 4 * Hp).astype(jnp.float32)                            # (1, 4Hp)

    w_out_p = jnp.pad(w_out, ((0, Op - O), (0, Hp - H)))
    w_out_t = jnp.transpose(w_out_p).astype(jnp.bfloat16)                   # (Hp, Op)
    b_o = jnp.pad(b_out, (0, Op - O)).reshape(1, Op).astype(jnp.float32)    # (1, Op)

    grid = (Bp // Bb, Tp // Tc)
    kernel = functools.partial(dplstm_kernel, t_total=T)

    out = pl.pallas_call(
        kernel,
        out_shape=jax.ShapeDtypeStruct((Bp, Op), jnp.float32),
        grid_spec=pltpu.PrefetchScalarGridSpec(
            num_scalar_prefetch=0,
            grid=grid,
            in_specs=[
                pl.BlockSpec((Tc, Bb, E), lambda bi, ti: (ti, bi, 0)),
                pl.BlockSpec((E, 4 * Hp), lambda bi, ti: (0, 0)),
                pl.BlockSpec((Hp, 4 * Hp), lambda bi, ti: (0, 0)),
                pl.BlockSpec((1, 4 * Hp), lambda bi, ti: (0, 0)),
                pl.BlockSpec((Hp, Op), lambda bi, ti: (0, 0)),
                pl.BlockSpec((1, Op), lambda bi, ti: (0, 0)),
            ],
            out_specs=pl.BlockSpec((Bb, Op), lambda bi, ti: (bi, 0)),
            scratch_shapes=[
                pltpu.VMEM((Tc * Bb, 4 * Hp), jnp.float32),  # gx
                pltpu.VMEM((Bb, Hp), jnp.float32),           # h carry
                pltpu.VMEM((Bb, Hp), jnp.float32),           # c carry
            ]),
        compiler_params=pltpu.CompilerParams(
            dimension_semantics=("parallel", "arbitrary"),
            vmem_limit_bytes=_vmem_limit_bytes(Tc, Bb, E, Hp, Op)),
    )(x, w_ih_t, w_hh_t, b, w_out_t, b_o)

    out = out[:B, :O]
    # PyTorch .squeeze(): drops all size-1 dims (matches original module).
    return jnp.squeeze(out)


def init_params(key, vocab_size, embedding_dim, hidden_dim, output_dim):
    ks = jax.random.split(key, 7)
    s = 1.0 / jnp.sqrt(hidden_dim)
    return {
        "emb":   jax.random.normal(ks[0], (vocab_size, embedding_dim), jnp.float32),
        # PyTorch LSTM parameter shapes: weight_ih (4H, E), weight_hh (4H, H)
        "w_ih":  jax.random.uniform(ks[1], (4 * hidden_dim, embedding_dim), jnp.float32, -s, s),
        "w_hh":  jax.random.uniform(ks[2], (4 * hidden_dim, hidden_dim), jnp.float32, -s, s),
        "b_ih":  jax.random.uniform(ks[3], (4 * hidden_dim,), jnp.float32, -s, s),
        "b_hh":  jax.random.uniform(ks[4], (4 * hidden_dim,), jnp.float32, -s, s),
        # nn.Linear: weight (O, H), bias (O,)
        "w_out": jax.random.uniform(ks[5], (output_dim, hidden_dim), jnp.float32, -s, s),
        "b_out": jax.random.uniform(ks[6], (output_dim,), jnp.float32, -s, s),
    }


if __name__ == "__main__":
    vocab_size, embedding_dim, hidden_dim, output_dim = 16, 32, 32, 8
    B, T = 2, 8

    key = jax.random.PRNGKey(0)
    pkey, tkey = jax.random.split(key)
    params = init_params(pkey, vocab_size, embedding_dim, hidden_dim, output_dim)
    tokens = jax.random.randint(tkey, (B, T), 0, vocab_size, dtype=jnp.int32)

    out = jax.jit(dplstm_forward)(tokens, params)
    jax.block_until_ready(out)
    assert out.shape == (B, output_dim)
    print("KERNEL_OK")
</pallas_src>

<mosaic_0001>
module attributes {stable_mosaic.version = 11 : i64} {
  func.func @dplstm_kernel(%arg0: i32, %arg1: i32, %arg2: memref<8x8x32xbf16, #tpu.memory_space<vmem>>, %arg3: memref<32x512xbf16, #tpu.memory_space<vmem>>, %arg4: memref<128x512xbf16, #tpu.memory_space<vmem>>, %arg5: memref<1x512xf32, #tpu.memory_space<vmem>>, %arg6: memref<128x128xbf16, #tpu.memory_space<vmem>>, %arg7: memref<1x128xf32, #tpu.memory_space<vmem>>, %arg8: memref<8x128xf32, #tpu.memory_space<vmem>>, %arg9: memref<64x512xf32, #tpu.memory_space<vmem>>, %arg10: memref<8x128xf32, #tpu.memory_space<vmem>>, %arg11: memref<8x128xf32, #tpu.memory_space<vmem>>) attributes {dimension_semantics = [#tpu.dimension_semantics<parallel>, #tpu.dimension_semantics<arbitrary>], iteration_bounds = array<i64: 1, 1>, scalar_prefetch = 0 : i64, scratch_operands = 3 : i64, tpu.core_type = #tpu.core_type<tc>, window_params = [{transform_indices = @transform_0, window_bounds = array<i64: 8, 8, 32>}, {pipeline_mode = #tpu.pipeline_mode<synchronous>, transform_indices = @transform_1, window_bounds = array<i64: 32, 512>}, {pipeline_mode = #tpu.pipeline_mode<synchronous>, transform_indices = @transform_2, window_bounds = array<i64: 128, 512>}, {pipeline_mode = #tpu.pipeline_mode<synchronous>, transform_indices = @transform_3, window_bounds = array<i64: 1, 512>}, {pipeline_mode = #tpu.pipeline_mode<synchronous>, transform_indices = @transform_4, window_bounds = array<i64: 128, 128>}, {pipeline_mode = #tpu.pipeline_mode<synchronous>, transform_indices = @transform_5, window_bounds = array<i64: 1, 128>}, {transform_indices = @transform_6, window_bounds = array<i64: 8, 128>}]} {
    %c0_i32 = arith.constant 0 : i32
    %0 = arith.cmpi eq, %arg1, %c0_i32 : i32
    %1 = arith.extui %0 : i1 to i32
    %c0_i32_0 = arith.constant 0 : i32
    %2 = arith.cmpi ne, %1, %c0_i32_0 : i32
    scf.if %2 {
      %cst_132 = arith.constant 0.000000e+00 : f32
      %344 = vector.broadcast %cst_132 : f32 to vector<8x128xf32>
      %c0_133 = arith.constant 0 : index
      %c0_134 = arith.constant 0 : index
      %345 = vector.load %arg10[%c0_133, %c0_134] : memref<8x128xf32, #tpu.memory_space<vmem>>, vector<8x128xf32>
      tpu.vector_store %arg10[%c0_133, %c0_134], %344 {strides = array<i32>} : memref<8x128xf32, #tpu.memory_space<vmem>>, vector<8x128xf32>,
      %cst_135 = arith.constant 0.000000e+00 : f32
      %346 = vector.broadcast %cst_135 : f32 to vector<8x128xf32>
      %c0_136 = arith.constant 0 : index
      %c0_137 = arith.constant 0 : index
      %347 = vector.load %arg11[%c0_136, %c0_137] : memref<8x128xf32, #tpu.memory_space<vmem>>, vector<8x128xf32>
      tpu.vector_store %arg11[%c0_136, %c0_137], %346 {strides = array<i32>} : memref<8x128xf32, #tpu.memory_space<vmem>>, vector<8x128xf32>,
    } else {
    }
    %c0 = arith.constant 0 : index
    %c0_1 = arith.constant 0 : index
    %c0_2 = arith.constant 0 : index
    %3 = vector.load %arg2[%c0, %c0_1, %c0_2] : memref<8x8x32xbf16, #tpu.memory_space<vmem>>, vector<8x8x32xbf16>
    %4 = vector.shape_cast %3 : vector<8x8x32xbf16> to vector<64x32xbf16>
    %c0_3 = arith.constant 0 : index
    %c0_4 = arith.constant 0 : index
    %5 = vector.load %arg3[%c0_3, %c0_4] : memref<32x512xbf16, #tpu.memory_space<vmem>>, vector<32x512xbf16>
    %cst = arith.constant dense<0.000000e+00> : vector<64x512xf32>
    %6 = tpu.matmul %4, %5, %cst {dimension_numbers = #tpu.dot_dimension_numbers<[1], [0], [0], [1], [0, 0, 1, 1], [], []>} : vector<64x32xbf16>, vector<32x512xbf16>, vector<64x512xf32> -> vector<64x512xf32>
    %c0_5 = arith.constant 0 : index
    %c0_6 = arith.constant 0 : index
    %7 = vector.load %arg9[%c0_5, %c0_6] : memref<64x512xf32, #tpu.memory_space<vmem>>, vector<64x512xf32>
    tpu.vector_store %arg9[%c0_5, %c0_6], %6 {strides = array<i32>} : memref<64x512xf32, #tpu.memory_space<vmem>>, vector<64x512xf32>,
    %c0_7 = arith.constant 0 : index
    %c0_8 = arith.constant 0 : index
    %8 = vector.load %arg5[%c0_7, %c0_8] : memref<1x512xf32, #tpu.memory_space<vmem>>, vector<1x512xf32>
    %c0_9 = arith.constant 0 : index
    %c0_10 = arith.constant 0 : index
    %9 = vector.load %arg10[%c0_9, %c0_10] : memref<8x128xf32, #tpu.memory_space<vmem>>, vector<8x128xf32>
    %c0_11 = arith.constant 0 : index
    %c0_12 = arith.constant 0 : index
    %10 = vector.load %arg11[%c0_11, %c0_12] : memref<8x128xf32, #tpu.memory_space<vmem>>, vector<8x128xf32>
    %c0_i32_13 = arith.constant 0 : i32
    %c8_i32 = arith.constant 8 : i32
    %11 = arith.muli %c0_i32_13, %c8_i32 : i32
    %12 = tpu.assume_multiple %11, 8 : i32
    %13 = arith.index_cast %12 : i32 to index
    %c0_14 = arith.constant 0 : index
    %14 = vector.load %arg9[%13, %c0_14] : memref<64x512xf32, #tpu.memory_space<vmem>>, vector<8x512xf32>
    %15 = vector.broadcast %8 : vector<1x512xf32> to vector<8x512xf32>
    %16 = arith.addf %14, %15 : vector<8x512xf32>
    %17 = arith.truncf %9 : vector<8x128xf32> to vector<8x128xbf16>
    %c0_15 = arith.constant 0 : index
    %c0_16 = arith.constant 0 : index
    %18 = vector.load %arg4[%c0_15, %c0_16] : memref<128x512xbf16, #tpu.memory_space<vmem>>, vector<128x512xbf16>
    %cst_17 = arith.constant dense<0.000000e+00> : vector<8x512xf32>
    %19 = tpu.matmul %17, %18, %cst_17 {dimension_numbers = #tpu.dot_dimension_numbers<[1], [0], [0], [1], [0, 0, 1, 1], [], []>} : vector<8x128xbf16>, vector<128x512xbf16>, vector<8x512xf32> -> vector<8x512xf32>
    %20 = arith.addf %16, %19 : vector<8x512xf32>
    %21 = vector.extract_strided_slice %20 {offsets = [0, 0], sizes = [8, 128], strides = [1, 1]} : vector<8x512xf32> to vector<8x128xf32>
    %cst_18 = arith.constant 5.000000e-01 : f32
    %22 = vector.broadcast %cst_18 : f32 to vector<8x128xf32>
    %23 = arith.mulf %22, %21 : vector<8x128xf32>
    %24 = math.tanh %23 : vector<8x128xf32>
    %cst_19 = arith.constant 5.000000e-01 : f32
    %25 = vector.broadcast %cst_19 : f32 to vector<8x128xf32>
    %26 = arith.mulf %25, %24 : vector<8x128xf32>
    %cst_20 = arith.constant 5.000000e-01 : f32
    %27 = vector.broadcast %cst_20 : f32 to vector<8x128xf32>
    %28 = arith.addf %26, %27 : vector<8x128xf32>
    %29 = vector.extract_strided_slice %20 {offsets = [0, 128], sizes = [8, 128], strides = [1, 1]} : vector<8x512xf32> to vector<8x128xf32>
    %cst_21 = arith.constant 5.000000e-01 : f32
    %30 = vector.broadcast %cst_21 : f32 to vector<8x128xf32>
    %31 = arith.mulf %30, %29 : vector<8x128xf32>
    %32 = math.tanh %31 : vector<8x128xf32>
    %cst_22 = arith.constant 5.000000e-01 : f32
    %33 = vector.broadcast %cst_22 : f32 to vector<8x128xf32>
    %34 = arith.mulf %33, %32 : vector<8x128xf32>
    %cst_23 = arith.constant 5.000000e-01 : f32
    %35 = vector.broadcast %cst_23 : f32 to vector<8x128xf32>
    %36 = arith.addf %34, %35 : vector<8x128xf32>
    %37 = vector.extract_strided_slice %20 {offsets = [0, 256], sizes = [8, 128], strides = [1, 1]} : vector<8x512xf32> to vector<8x128xf32>
    %38 = math.tanh %37 : vector<8x128xf32>
    %39 = vector.extract_strided_slice %20 {offsets = [0, 384], sizes = [8, 128], strides = [1, 1]} : vector<8x512xf32> to vector<8x128xf32>
    %cst_24 = arith.constant 5.000000e-01 : f32
    %40 = vector.broadcast %cst_24 : f32 to vector<8x128xf32>
    %41 = arith.mulf %40, %39 : vector<8x128xf32>
    %42 = math.tanh %41 : vector<8x128xf32>
    %cst_25 = arith.constant 5.000000e-01 : f32
    %43 = vector.broadcast %cst_25 : f32 to vector<8x128xf32>
    %44 = arith.mulf %43, %42 : vector<8x128xf32>
    %cst_26 = arith.constant 5.000000e-01 : f32
    %45 = vector.broadcast %cst_26 : f32 to vector<8x128xf32>
    %46 = arith.addf %44, %45 : vector<8x128xf32>
    %47 = arith.mulf %36, %10 : vector<8x128xf32>
    %48 = arith.mulf %28, %38 : vector<8x128xf32>
    %49 = arith.addf %47, %48 : vector<8x128xf32>
    %50 = math.tanh %49 : vector<8x128xf32>
    %51 = arith.mulf %46, %50 : vector<8x128xf32>
    %c1_i32 = arith.constant 1 : i32
    %c8_i32_27 = arith.constant 8 : i32
    %52 = arith.muli %c1_i32, %c8_i32_27 : i32
    %53 = tpu.assume_multiple %52, 8 : i32
    %54 = arith.index_cast %53 : i32 to index
    %c0_28 = arith.constant 0 : index
    %55 = vector.load %arg9[%54, %c0_28] : memref<64x512xf32, #tpu.memory_space<vmem>>, vector<8x512xf32>
    %56 = vector.broadcast %8 : vector<1x512xf32> to vector<8x512xf32>
    %57 = arith.addf %55, %56 : vector<8x512xf32>
    %58 = arith.truncf %51 : vector<8x128xf32> to vector<8x128xbf16>
    %c0_29 = arith.constant 0 : index
    %c0_30 = arith.constant 0 : index
    %59 = vector.load %arg4[%c0_29, %c0_30] : memref<128x512xbf16, #tpu.memory_space<vmem>>, vector<128x512xbf16>
    %cst_31 = arith.constant dense<0.000000e+00> : vector<8x512xf32>
    %60 = tpu.matmul %58, %59, %cst_31 {dimension_numbers = #tpu.dot_dimension_numbers<[1], [0], [0], [1], [0, 0, 1, 1], [], []>} : vector<8x128xbf16>, vector<128x512xbf16>, vector<8x512xf32> -> vector<8x512xf32>
    %61 = arith.addf %57, %60 : vector<8x512xf32>
    %62 = vector.extract_strided_slice %61 {offsets = [0, 0], sizes = [8, 128], strides = [1, 1]} : vector<8x512xf32> to vector<8x128xf32>
    %cst_32 = arith.constant 5.000000e-01 : f32
    %63 = vector.broadcast %cst_32 : f32 to vector<8x128xf32>
    %64 = arith.mulf %63, %62 : vector<8x128xf32>
    %65 = math.tanh %64 : vector<8x128xf32>
    %cst_33 = arith.constant 5.000000e-01 : f32
    %66 = vector.broadcast %cst_33 : f32 to vector<8x128xf32>
    %67 = arith.mulf %66, %65 : vector<8x128xf32>
    %cst_34 = arith.constant 5.000000e-01 : f32
    %68 = vector.broadcast %cst_34 : f32 to vector<8x128xf32>
    %69 = arith.addf %67, %68 : vector<8x128xf32>
    %70 = vector.extract_strided_slice %61 {offsets = [0, 128], sizes = [8, 128], strides = [1, 1]} : vector<8x512xf32> to vector<8x128xf32>
    %cst_35 = arith.constant 5.000000e-01 : f32
    %71 = vector.broadcast %cst_35 : f32 to vector<8x128xf32>
    %72 = arith.mulf %71, %70 : vector<8x128xf32>
    %73 = math.tanh %72 : vector<8x128xf32>
    %cst_36 = arith.constant 5.000000e-01 : f32
    %74 = vector.broadcast %cst_36 : f32 to vector<8x128xf32>
    %75 = arith.mulf %74, %73 : vector<8x128xf32>
    %cst_37 = arith.constant 5.000000e-01 : f32
    %76 = vector.broadcast %cst_37 : f32 to vector<8x128xf32>
    %77 = arith.addf %75, %76 : vector<8x128xf32>
    %78 = vector.extract_strided_slice %61 {offsets = [0, 256], sizes = [8, 128], strides = [1, 1]} : vector<8x512xf32> to vector<8x128xf32>
    %79 = math.tanh %78 : vector<8x128xf32>
    %80 = vector.extract_strided_slice %61 {offsets = [0, 384], sizes = [8, 128], strides = [1, 1]} : vector<8x512xf32> to vector<8x128xf32>
    %cst_38 = arith.constant 5.000000e-01 : f32
    %81 = vector.broadcast %cst_38 : f32 to vector<8x128xf32>
    %82 = arith.mulf %81, %80 : vector<8x128xf32>
    %83 = math.tanh %82 : vector<8x128xf32>
    %cst_39 = arith.constant 5.000000e-01 : f32
    %84 = vector.broadcast %cst_39 : f32 to vector<8x128xf32>
    %85 = arith.mulf %84, %83 : vector<8x128xf32>
    %cst_40 = arith.constant 5.000000e-01 : f32
    %86 = vector.broadcast %cst_40 : f32 to vector<8x128xf32>
    %87 = arith.addf %85, %86 : vector<8x128xf32>
    %88 = arith.mulf %77, %49 : vector<8x128xf32>
    %89 = arith.mulf %69, %79 : vector<8x128xf32>
    %90 = arith.addf %88, %89 : vector<8x128xf32>
    %91 = math.tanh %90 : vector<8x128xf32>
    %92 = arith.mulf %87, %91 : vector<8x128xf32>
    %c2_i32 = arith.constant 2 : i32
    %c8_i32_41 = arith.constant 8 : i32
    %93 = arith.muli %c2_i32, %c8_i32_41 : i32
    %94 = tpu.assume_multiple %93, 8 : i32
    %95 = arith.index_cast %94 : i32 to index
    %c0_42 = arith.constant 0 : index
    %96 = vector.load %arg9[%95, %c0_42] : memref<64x512xf32, #tpu.memory_space<vmem>>, vector<8x512xf32>
    %97 = vector.broadcast %8 : vector<1x512xf32> to vector<8x512xf32>
    %98 = arith.addf %96, %97 : vector<8x512xf32>
    %99 = arith.truncf %92 : vector<8x128xf32> to vector<8x128xbf16>
    %c0_43 = arith.constant 0 : index
    %c0_44 = arith.constant 0 : index
    %100 = vector.load %arg4[%c0_43, %c0_44] : memref<128x512xbf16, #tpu.memory_space<vmem>>, vector<128x512xbf16>
    %cst_45 = arith.constant dense<0.000000e+00> : vector<8x512xf32>
    %101 = tpu.matmul %99, %100, %cst_45 {dimension_numbers = #tpu.dot_dimension_numbers<[1], [0], [0], [1], [0, 0, 1, 1], [], []>} : vector<8x128xbf16>, vector<128x512xbf16>, vector<8x512xf32> -> vector<8x512xf32>
    %102 = arith.addf %98, %101 : vector<8x512xf32>
    %103 = vector.extract_strided_slice %102 {offsets = [0, 0], sizes = [8, 128], strides = [1, 1]} : vector<8x512xf32> to vector<8x128xf32>
    %cst_46 = arith.constant 5.000000e-01 : f32
    %104 = vector.broadcast %cst_46 : f32 to vector<8x128xf32>
    %105 = arith.mulf %104, %103 : vector<8x128xf32>
    %106 = math.tanh %105 : vector<8x128xf32>
    %cst_47 = arith.constant 5.000000e-01 : f32
    %107 = vector.broadcast %cst_47 : f32 to vector<8x128xf32>
    %108 = arith.mulf %107, %106 : vector<8x128xf32>
    %cst_48 = arith.constant 5.000000e-01 : f32
    %109 = vector.broadcast %cst_48 : f32 to vector<8x128xf32>
    %110 = arith.addf %108, %109 : vector<8x128xf32>
    %111 = vector.extract_strided_slice %102 {offsets = [0, 128], sizes = [8, 128], strides = [1, 1]} : vector<8x512xf32> to vector<8x128xf32>
    %cst_49 = arith.constant 5.000000e-01 : f32
    %112 = vector.broadcast %cst_49 : f32 to vector<8x128xf32>
    %113 = arith.mulf %112, %111 : vector<8x128xf32>
    %114 = math.tanh %113 : vector<8x128xf32>
    %cst_50 = arith.constant 5.000000e-01 : f32
    %115 = vector.broadcast %cst_50 : f32 to vector<8x128xf32>
    %116 = arith.mulf %115, %114 : vector<8x128xf32>
    %cst_51 = arith.constant 5.000000e-01 : f32
    %117 = vector.broadcast %cst_51 : f32 to vector<8x128xf32>
    %118 = arith.addf %116, %117 : vector<8x128xf32>
    %119 = vector.extract_strided_slice %102 {offsets = [0, 256], sizes = [8, 128], strides = [1, 1]} : vector<8x512xf32> to vector<8x128xf32>
    %120 = math.tanh %119 : vector<8x128xf32>
    %121 = vector.extract_strided_slice %102 {offsets = [0, 384], sizes = [8, 128], strides = [1, 1]} : vector<8x512xf32> to vector<8x128xf32>
    %cst_52 = arith.constant 5.000000e-01 : f32
    %122 = vector.broadcast %cst_52 : f32 to vector<8x128xf32>
    %123 = arith.mulf %122, %121 : vector<8x128xf32>
    %124 = math.tanh %123 : vector<8x128xf32>
    %cst_53 = arith.constant 5.000000e-01 : f32
    %125 = vector.broadcast %cst_53 : f32 to vector<8x128xf32>
    %126 = arith.mulf %125, %124 : vector<8x128xf32>
    %cst_54 = arith.constant 5.000000e-01 : f32
    %127 = vector.broadcast %cst_54 : f32 to vector<8x128xf32>
    %128 = arith.addf %126, %127 : vector<8x128xf32>
    %129 = arith.mulf %118, %90 : vector<8x128xf32>
    %130 = arith.mulf %110, %120 : vector<8x128xf32>
    %131 = arith.addf %129, %130 : vector<8x128xf32>
    %132 = math.tanh %131 : vector<8x128xf32>
    %133 = arith.mulf %128, %132 : vector<8x128xf32>
    %c3_i32 = arith.constant 3 : i32
    %c8_i32_55 = arith.constant 8 : i32
    %134 = arith.muli %c3_i32, %c8_i32_55 : i32
    %135 = tpu.assume_multiple %134, 8 : i32
    %136 = arith.index_cast %135 : i32 to index
    %c0_56 = arith.constant 0 : index
    %137 = vector.load %arg9[%136, %c0_56] : memref<64x512xf32, #tpu.memory_space<vmem>>, vector<8x512xf32>
    %138 = vector.broadcast %8 : vector<1x512xf32> to vector<8x512xf32>
    %139 = arith.addf %137, %138 : vector<8x512xf32>
    %140 = arith.truncf %133 : vector<8x128xf32> to vector<8x128xbf16>
    %c0_57 = arith.constant 0 : index
    %c0_58 = arith.constant 0 : index
    %141 = vector.load %arg4[%c0_57, %c0_58] : memref<128x512xbf16, #tpu.memory_space<vmem>>, vector<128x512xbf16>
    %cst_59 = arith.constant dense<0.000000e+00> : vector<8x512xf32>
    %142 = tpu.matmul %140, %141, %cst_59 {dimension_numbers = #tpu.dot_dimension_numbers<[1], [0], [0], [1], [0, 0, 1, 1], [], []>} : vector<8x128xbf16>, vector<128x512xbf16>, vector<8x512xf32> -> vector<8x512xf32>
    %143 = arith.addf %139, %142 : vector<8x512xf32>
    %144 = vector.extract_strided_slice %143 {offsets = [0, 0], sizes = [8, 128], strides = [1, 1]} : vector<8x512xf32> to vector<8x128xf32>
    %cst_60 = arith.constant 5.000000e-01 : f32
    %145 = vector.broadcast %cst_60 : f32 to vector<8x128xf32>
    %146 = arith.mulf %145, %144 : vector<8x128xf32>
    %147 = math.tanh %146 : vector<8x128xf32>
    %cst_61 = arith.constant 5.000000e-01 : f32
    %148 = vector.broadcast %cst_61 : f32 to vector<8x128xf32>
    %149 = arith.mulf %148, %147 : vector<8x128xf32>
    %cst_62 = arith.constant 5.000000e-01 : f32
    %150 = vector.broadcast %cst_62 : f32 to vector<8x128xf32>
    %151 = arith.addf %149, %150 : vector<8x128xf32>
    %152 = vector.extract_strided_slice %143 {offsets = [0, 128], sizes = [8, 128], strides = [1, 1]} : vector<8x512xf32> to vector<8x128xf32>
    %cst_63 = arith.constant 5.000000e-01 : f32
    %153 = vector.broadcast %cst_63 : f32 to vector<8x128xf32>
    %154 = arith.mulf %153, %152 : vector<8x128xf32>
    %155 = math.tanh %154 : vector<8x128xf32>
    %cst_64 = arith.constant 5.000000e-01 : f32
    %156 = vector.broadcast %cst_64 : f32 to vector<8x128xf32>
    %157 = arith.mulf %156, %155 : vector<8x128xf32>
    %cst_65 = arith.constant 5.000000e-01 : f32
    %158 = vector.broadcast %cst_65 : f32 to vector<8x128xf32>
    %159 = arith.addf %157, %158 : vector<8x128xf32>
    %160 = vector.extract_strided_slice %143 {offsets = [0, 256], sizes = [8, 128], strides = [1, 1]} : vector<8x512xf32> to vector<8x128xf32>
    %161 = math.tanh %160 : vector<8x128xf32>
    %162 = vector.extract_strided_slice %143 {offsets = [0, 384], sizes = [8, 128], strides = [1, 1]} : vector<8x512xf32> to vector<8x128xf32>
    %cst_66 = arith.constant 5.000000e-01 : f32
    %163 = vector.broadcast %cst_66 : f32 to vector<8x128xf32>
    %164 = arith.mulf %163, %162 : vector<8x128xf32>
    %165 = math.tanh %164 : vector<8x128xf32>
    %cst_67 = arith.constant 5.000000e-01 : f32
    %166 = vector.broadcast %cst_67 : f32 to vector<8x128xf32>
    %167 = arith.mulf %166, %165 : vector<8x128xf32>
    %cst_68 = arith.constant 5.000000e-01 : f32
    %168 = vector.broadcast %cst_68 : f32 to vector<8x128xf32>
    %169 = arith.addf %167, %168 : vector<8x128xf32>
    %170 = arith.mulf %159, %131 : vector<8x128xf32>
    %171 = arith.mulf %151, %161 : vector<8x128xf32>
    %172 = arith.addf %170, %171 : vector<8x128xf32>
    %173 = math.tanh %172 : vector<8x128xf32>
    %174 = arith.mulf %169, %173 : vector<8x128xf32>
    %c4_i32 = arith.constant 4 : i32
    %c8_i32_69 = arith.constant 8 : i32
    %175 = arith.muli %c4_i32, %c8_i32_69 : i32
    %176 = tpu.assume_multiple %175, 8 : i32
    %177 = arith.index_cast %176 : i32 to index
    %c0_70 = arith.constant 0 : index
    %178 = vector.load %arg9[%177, %c0_70] : memref<64x512xf32, #tpu.memory_space<vmem>>, vector<8x512xf32>
    %179 = vector.broadcast %8 : vector<1x512xf32> to vector<8x512xf32>
    %180 = arith.addf %178, %179 : vector<8x512xf32>
    %181 = arith.truncf %174 : vector<8x128xf32> to vector<8x128xbf16>
    %c0_71 = arith.constant 0 : index
    %c0_72 = arith.constant 0 : index
    %182 = vector.load %arg4[%c0_71, %c0_72] : memref<128x512xbf16, #tpu.memory_space<vmem>>, vector<128x512xbf16>
    %cst_73 = arith.constant dense<0.000000e+00> : vector<8x512xf32>
    %183 = tpu.matmul %181, %182, %cst_73 {dimension_numbers = #tpu.dot_dimension_numbers<[1], [0], [0], [1], [0, 0, 1, 1], [], []>} : vector<8x128xbf16>, vector<128x512xbf16>, vector<8x512xf32> -> vector<8x512xf32>
    %184 = arith.addf %180, %183 : vector<8x512xf32>
    %185 = vector.extract_strided_slice %184 {offsets = [0, 0], sizes = [8, 128], strides = [1, 1]} : vector<8x512xf32> to vector<8x128xf32>
    %cst_74 = arith.constant 5.000000e-01 : f32
    %186 = vector.broadcast %cst_74 : f32 to vector<8x128xf32>
    %187 = arith.mulf %186, %185 : vector<8x128xf32>
    %188 = math.tanh %187 : vector<8x128xf32>
    %cst_75 = arith.constant 5.000000e-01 : f32
    %189 = vector.broadcast %cst_75 : f32 to vector<8x128xf32>
    %190 = arith.mulf %189, %188 : vector<8x128xf32>
    %cst_76 = arith.constant 5.000000e-01 : f32
    %191 = vector.broadcast %cst_76 : f32 to vector<8x128xf32>
    %192 = arith.addf %190, %191 : vector<8x128xf32>
    %193 = vector.extract_strided_slice %184 {offsets = [0, 128], sizes = [8, 128], strides = [1, 1]} : vector<8x512xf32> to vector<8x128xf32>
    %cst_77 = arith.constant 5.000000e-01 : f32
    %194 = vector.broadcast %cst_77 : f32 to vector<8x128xf32>
    %195 = arith.mulf %194, %193 : vector<8x128xf32>
    %196 = math.tanh %195 : vector<8x128xf32>
    %cst_78 = arith.constant 5.000000e-01 : f32
    %197 = vector.broadcast %cst_78 : f32 to vector<8x128xf32>
    %198 = arith.mulf %197, %196 : vector<8x128xf32>
    %cst_79 = arith.constant 5.000000e-01 : f32
    %199 = vector.broadcast %cst_79 : f32 to vector<8x128xf32>
    %200 = arith.addf %198, %199 : vector<8x128xf32>
    %201 = vector.extract_strided_slice %184 {offsets = [0, 256], sizes = [8, 128], strides = [1, 1]} : vector<8x512xf32> to vector<8x128xf32>
    %202 = math.tanh %201 : vector<8x128xf32>
    %203 = vector.extract_strided_slice %184 {offsets = [0, 384], sizes = [8, 128], strides = [1, 1]} : vector<8x512xf32> to vector<8x128xf32>
    %cst_80 = arith.constant 5.000000e-01 : f32
    %204 = vector.broadcast %cst_80 : f32 to vector<8x128xf32>
    %205 = arith.mulf %204, %203 : vector<8x128xf32>
    %206 = math.tanh %205 : vector<8x128xf32>
    %cst_81 = arith.constant 5.000000e-01 : f32
    %207 = vector.broadcast %cst_81 : f32 to vector<8x128xf32>
    %208 = arith.mulf %207, %206 : vector<8x128xf32>
    %cst_82 = arith.constant 5.000000e-01 : f32
    %209 = vector.broadcast %cst_82 : f32 to vector<8x128xf32>
    %210 = arith.addf %208, %209 : vector<8x128xf32>
    %211 = arith.mulf %200, %172 : vector<8x128xf32>
    %212 = arith.mulf %192, %202 : vector<8x128xf32>
    %213 = arith.addf %211, %212 : vector<8x128xf32>
    %214 = math.tanh %213 : vector<8x128xf32>
    %215 = arith.mulf %210, %214 : vector<8x128xf32>
    %c5_i32 = arith.constant 5 : i32
    %c8_i32_83 = arith.constant 8 : i32
    %216 = arith.muli %c5_i32, %c8_i32_83 : i32
    %217 = tpu.assume_multiple %216, 8 : i32
    %218 = arith.index_cast %217 : i32 to index
    %c0_84 = arith.constant 0 : index
    %219 = vector.load %arg9[%218, %c0_84] : memref<64x512xf32, #tpu.memory_space<vmem>>, vector<8x512xf32>
    %220 = vector.broadcast %8 : vector<1x512xf32> to vector<8x512xf32>
    %221 = arith.addf %219, %220 : vector<8x512xf32>
    %222 = arith.truncf %215 : vector<8x128xf32> to vector<8x128xbf16>
    %c0_85 = arith.constant 0 : index
    %c0_86 = arith.constant 0 : index
    %223 = vector.load %arg4[%c0_85, %c0_86] : memref<128x512xbf16, #tpu.memory_space<vmem>>, vector<128x512xbf16>
    %cst_87 = arith.constant dense<0.000000e+00> : vector<8x512xf32>
    %224 = tpu.matmul %222, %223, %cst_87 {dimension_numbers = #tpu.dot_dimension_numbers<[1], [0], [0], [1], [0, 0, 1, 1], [], []>} : vector<8x128xbf16>, vector<128x512xbf16>, vector<8x512xf32> -> vector<8x512xf32>
    %225 = arith.addf %221, %224 : vector<8x512xf32>
    %226 = vector.extract_strided_slice %225 {offsets = [0, 0], sizes = [8, 128], strides = [1, 1]} : vector<8x512xf32> to vector<8x128xf32>
    %cst_88 = arith.constant 5.000000e-01 : f32
    %227 = vector.broadcast %cst_88 : f32 to vector<8x128xf32>
    %228 = arith.mulf %227, %226 : vector<8x128xf32>
    %229 = math.tanh %228 : vector<8x128xf32>
    %cst_89 = arith.constant 5.000000e-01 : f32
    %230 = vector.broadcast %cst_89 : f32 to vector<8x128xf32>
    %231 = arith.mulf %230, %229 : vector<8x128xf32>
    %cst_90 = arith.constant 5.000000e-01 : f32
    %232 = vector.broadcast %cst_90 : f32 to vector<8x128xf32>
    %233 = arith.addf %231, %232 : vector<8x128xf32>
    %234 = vector.extract_strided_slice %225 {offsets = [0, 128], sizes = [8, 128], strides = [1, 1]} : vector<8x512xf32> to vector<8x128xf32>
    %cst_91 = arith.constant 5.000000e-01 : f32
    %235 = vector.broadcast %cst_91 : f32 to vector<8x128xf32>
    %236 = arith.mulf %235, %234 : vector<8x128xf32>
    %237 = math.tanh %236 : vector<8x128xf32>
    %cst_92 = arith.constant 5.000000e-01 : f32
    %238 = vector.broadcast %cst_92 : f32 to vector<8x128xf32>
    %239 = arith.mulf %238, %237 : vector<8x128xf32>
    %cst_93 = arith.constant 5.000000e-01 : f32
    %240 = vector.broadcast %cst_93 : f32 to vector<8x128xf32>
    %241 = arith.addf %239, %240 : vector<8x128xf32>
    %242 = vector.extract_strided_slice %225 {offsets = [0, 256], sizes = [8, 128], strides = [1, 1]} : vector<8x512xf32> to vector<8x128xf32>
    %243 = math.tanh %242 : vector<8x128xf32>
    %244 = vector.extract_strided_slice %225 {offsets = [0, 384], sizes = [8, 128], strides = [1, 1]} : vector<8x512xf32> to vector<8x128xf32>
    %cst_94 = arith.constant 5.000000e-01 : f32
    %245 = vector.broadcast %cst_94 : f32 to vector<8x128xf32>
    %246 = arith.mulf %245, %244 : vector<8x128xf32>
    %247 = math.tanh %246 : vector<8x128xf32>
    %cst_95 = arith.constant 5.000000e-01 : f32
    %248 = vector.broadcast %cst_95 : f32 to vector<8x128xf32>
    %249 = arith.mulf %248, %247 : vector<8x128xf32>
    %cst_96 = arith.constant 5.000000e-01 : f32
    %250 = vector.broadcast %cst_96 : f32 to vector<8x128xf32>
    %251 = arith.addf %249, %250 : vector<8x128xf32>
    %252 = arith.mulf %241, %213 : vector<8x128xf32>
    %253 = arith.mulf %233, %243 : vector<8x128xf32>
    %254 = arith.addf %252, %253 : vector<8x128xf32>
    %255 = math.tanh %254 : vector<8x128xf32>
    %256 = arith.mulf %251, %255 : vector<8x128xf32>
    %c6_i32 = arith.constant 6 : i32
    %c8_i32_97 = arith.constant 8 : i32
    %257 = arith.muli %c6_i32, %c8_i32_97 : i32
    %258 = tpu.assume_multiple %257, 8 : i32
    %259 = arith.index_cast %258 : i32 to index
    %c0_98 = arith.constant 0 : index
    %260 = vector.load %arg9[%259, %c0_98] : memref<64x512xf32, #tpu.memory_space<vmem>>, vector<8x512xf32>
    %261 = vector.broadcast %8 : vector<1x512xf32> to vector<8x512xf32>
    %262 = arith.addf %260, %261 : vector<8x512xf32>
    %263 = arith.truncf %256 : vector<8x128xf32> to vector<8x128xbf16>
    %c0_99 = arith.constant 0 : index
    %c0_100 = arith.constant 0 : index
    %264 = vector.load %arg4[%c0_99, %c0_100] : memref<128x512xbf16, #tpu.memory_space<vmem>>, vector<128x512xbf16>
    %cst_101 = arith.constant dense<0.000000e+00> : vector<8x512xf32>
    %265 = tpu.matmul %263, %264, %cst_101 {dimension_numbers = #tpu.dot_dimension_numbers<[1], [0], [0], [1], [0, 0, 1, 1], [], []>} : vector<8x128xbf16>, vector<128x512xbf16>, vector<8x512xf32> -> vector<8x512xf32>
    %266 = arith.addf %262, %265 : vector<8x512xf32>
    %267 = vector.extract_strided_slice %266 {offsets = [0, 0], sizes = [8, 128], strides = [1, 1]} : vector<8x512xf32> to vector<8x128xf32>
    %cst_102 = arith.constant 5.000000e-01 : f32
    %268 = vector.broadcast %cst_102 : f32 to vector<8x128xf32>
    %269 = arith.mulf %268, %267 : vector<8x128xf32>
    %270 = math.tanh %269 : vector<8x128xf32>
    %cst_103 = arith.constant 5.000000e-01 : f32
    %271 = vector.broadcast %cst_103 : f32 to vector<8x128xf32>
    %272 = arith.mulf %271, %270 : vector<8x128xf32>
    %cst_104 = arith.constant 5.000000e-01 : f32
    %273 = vector.broadcast %cst_104 : f32 to vector<8x128xf32>
    %274 = arith.addf %272, %273 : vector<8x128xf32>
    %275 = vector.extract_strided_slice %266 {offsets = [0, 128], sizes = [8, 128], strides = [1, 1]} : vector<8x512xf32> to vector<8x128xf32>
    %cst_105 = arith.constant 5.000000e-01 : f32
    %276 = vector.broadcast %cst_105 : f32 to vector<8x128xf32>
    %277 = arith.mulf %276, %275 : vector<8x128xf32>
    %278 = math.tanh %277 : vector<8x128xf32>
    %cst_106 = arith.constant 5.000000e-01 : f32
    %279 = vector.broadcast %cst_106 : f32 to vector<8x128xf32>
    %280 = arith.mulf %279, %278 : vector<8x128xf32>
    %cst_107 = arith.constant 5.000000e-01 : f32
    %281 = vector.broadcast %cst_107 : f32 to vector<8x128xf32>
    %282 = arith.addf %280, %281 : vector<8x128xf32>
    %283 = vector.extract_strided_slice %266 {offsets = [0, 256], sizes = [8, 128], strides = [1, 1]} : vector<8x512xf32> to vector<8x128xf32>
    %284 = math.tanh %283 : vector<8x128xf32>
    %285 = vector.extract_strided_slice %266 {offsets = [0, 384], sizes = [8, 128], strides = [1, 1]} : vector<8x512xf32> to vector<8x128xf32>
    %cst_108 = arith.constant 5.000000e-01 : f32
    %286 = vector.broadcast %cst_108 : f32 to vector<8x128xf32>
    %287 = arith.mulf %286, %285 : vector<8x128xf32>
    %288 = math.tanh %287 : vector<8x128xf32>
    %cst_109 = arith.constant 5.000000e-01 : f32
    %289 = vector.broadcast %cst_109 : f32 to vector<8x128xf32>
    %290 = arith.mulf %289, %288 : vector<8x128xf32>
    %cst_110 = arith.constant 5.000000e-01 : f32
    %291 = vector.broadcast %cst_110 : f32 to vector<8x128xf32>
    %292 = arith.addf %290, %291 : vector<8x128xf32>
    %293 = arith.mulf %282, %254 : vector<8x128xf32>
    %294 = arith.mulf %274, %284 : vector<8x128xf32>
    %295 = arith.addf %293, %294 : vector<8x128xf32>
    %296 = math.tanh %295 : vector<8x128xf32>
    %297 = arith.mulf %292, %296 : vector<8x128xf32>
    %c7_i32 = arith.constant 7 : i32
    %c8_i32_111 = arith.constant 8 : i32
    %298 = arith.muli %c7_i32, %c8_i32_111 : i32
    %299 = tpu.assume_multiple %298, 8 : i32
    %300 = arith.index_cast %299 : i32 to index
    %c0_112 = arith.constant 0 : index
    %301 = vector.load %arg9[%300, %c0_112] : memref<64x512xf32, #tpu.memory_space<vmem>>, vector<8x512xf32>
    %302 = vector.broadcast %8 : vector<1x512xf32> to vector<8x512xf32>
    %303 = arith.addf %301, %302 : vector<8x512xf32>
    %304 = arith.truncf %297 : vector<8x128xf32> to vector<8x128xbf16>
    %c0_113 = arith.constant 0 : index
    %c0_114 = arith.constant 0 : index
    %305 = vector.load %arg4[%c0_113, %c0_114] : memref<128x512xbf16, #tpu.memory_space<vmem>>, vector<128x512xbf16>
    %cst_115 = arith.constant dense<0.000000e+00> : vector<8x512xf32>
    %306 = tpu.matmul %304, %305, %cst_115 {dimension_numbers = #tpu.dot_dimension_numbers<[1], [0], [0], [1], [0, 0, 1, 1], [], []>} : vector<8x128xbf16>, vector<128x512xbf16>, vector<8x512xf32> -> vector<8x512xf32>
    %307 = arith.addf %303, %306 : vector<8x512xf32>
    %308 = vector.extract_strided_slice %307 {offsets = [0, 0], sizes = [8, 128], strides = [1, 1]} : vector<8x512xf32> to vector<8x128xf32>
    %cst_116 = arith.constant 5.000000e-01 : f32
    %309 = vector.broadcast %cst_116 : f32 to vector<8x128xf32>
    %310 = arith.mulf %309, %308 : vector<8x128xf32>
    %311 = math.tanh %310 : vector<8x128xf32>
    %cst_117 = arith.constant 5.000000e-01 : f32
    %312 = vector.broadcast %cst_117 : f32 to vector<8x128xf32>
    %313 = arith.mulf %312, %311 : vector<8x128xf32>
    %cst_118 = arith.constant 5.000000e-01 : f32
    %314 = vector.broadcast %cst_118 : f32 to vector<8x128xf32>
    %315 = arith.addf %313, %314 : vector<8x128xf32>
    %316 = vector.extract_strided_slice %307 {offsets = [0, 128], sizes = [8, 128], strides = [1, 1]} : vector<8x512xf32> to vector<8x128xf32>
    %cst_119 = arith.constant 5.000000e-01 : f32
    %317 = vector.broadcast %cst_119 : f32 to vector<8x128xf32>
    %318 = arith.mulf %317, %316 : vector<8x128xf32>
    %319 = math.tanh %318 : vector<8x128xf32>
    %cst_120 = arith.constant 5.000000e-01 : f32
    %320 = vector.broadcast %cst_120 : f32 to vector<8x128xf32>
    %321 = arith.mulf %320, %319 : vector<8x128xf32>
    %cst_121 = arith.constant 5.000000e-01 : f32
    %322 = vector.broadcast %cst_121 : f32 to vector<8x128xf32>
    %323 = arith.addf %321, %322 : vector<8x128xf32>
    %324 = vector.extract_strided_slice %307 {offsets = [0, 256], sizes = [8, 128], strides = [1, 1]} : vector<8x512xf32> to vector<8x128xf32>
    %325 = math.tanh %324 : vector<8x128xf32>
    %326 = vector.extract_strided_slice %307 {offsets = [0, 384], sizes = [8, 128], strides = [1, 1]} : vector<8x512xf32> to vector<8x128xf32>
    %cst_122 = arith.constant 5.000000e-01 : f32
    %327 = vector.broadcast %cst_122 : f32 to vector<8x128xf32>
    %328 = arith.mulf %327, %326 : vector<8x128xf32>
    %329 = math.tanh %328 : vector<8x128xf32>
    %cst_123 = arith.constant 5.000000e-01 : f32
    %330 = vector.broadcast %cst_123 : f32 to vector<8x128xf32>
    %331 = arith.mulf %330, %329 : vector<8x128xf32>
    %cst_124 = arith.constant 5.000000e-01 : f32
    %332 = vector.broadcast %cst_124 : f32 to vector<8x128xf32>
    %333 = arith.addf %331, %332 : vector<8x128xf32>
    %334 = arith.mulf %323, %295 : vector<8x128xf32>
    %335 = arith.mulf %315, %325 : vector<8x128xf32>
    %336 = arith.addf %334, %335 : vector<8x128xf32>
    %337 = math.tanh %336 : vector<8x128xf32>
    %338 = arith.mulf %333, %337 : vector<8x128xf32>
    %c8_i32_125 = arith.constant 8 : i32
    %c0_126 = arith.constant 0 : index
    %c0_127 = arith.constant 0 : index
    %339 = vector.load %arg10[%c0_126, %c0_127] : memref<8x128xf32, #tpu.memory_space<vmem>>, vector<8x128xf32>
    tpu.vector_store %arg10[%c0_126, %c0_127], %338 {strides = array<i32>} : memref<8x128xf32, #tpu.memory_space<vmem>>, vector<8x128xf32>,
    %c0_128 = arith.constant 0 : index
    %c0_129 = arith.constant 0 : index
    %340 = vector.load %arg11[%c0_128, %c0_129] : memref<8x128xf32, #tpu.memory_space<vmem>>, vector<8x128xf32>
    tpu.vector_store %arg11[%c0_128, %c0_129], %336 {strides = array<i32>} : memref<8x128xf32, #tpu.memory_space<vmem>>, vector<8x128xf32>,
    %c0_i32_130 = arith.constant 0 : i32
    %341 = arith.cmpi eq, %arg1, %c0_i32_130 : i32
    %342 = arith.extui %341 : i1 to i32
    %c0_i32_131 = arith.constant 0 : i32
    %343 = arith.cmpi ne, %342, %c0_i32_131 : i32
    scf.if %343 {
      %344 = arith.truncf %338 : vector<8x128xf32> to vector<8x128xbf16>
      %c0_132 = arith.constant 0 : index
      %c0_133 = arith.constant 0 : index
      %345 = vector.load %arg6[%c0_132, %c0_133] : memref<128x128xbf16, #tpu.memory_space<vmem>>, vector<128x128xbf16>
      %cst_134 = arith.constant dense<0.000000e+00> : vector<8x128xf32>
      %346 = tpu.matmul %344, %345, %cst_134 {dimension_numbers = #tpu.dot_dimension_numbers<[1], [0], [0], [1], [0, 0, 1, 1], [], []>} : vector<8x128xbf16>, vector<128x128xbf16>, vector<8x128xf32> -> vector<8x128xf32>
      %c0_135 = arith.constant 0 : index
      %c0_136 = arith.constant 0 : index
      %347 = vector.load %arg7[%c0_135, %c0_136] : memref<1x128xf32, #tpu.memory_space<vmem>>, vector<1x128xf32>
      %348 = vector.broadcast %347 : vector<1x128xf32> to vector<8x128xf32>
      %349 = arith.addf %346, %348 : vector<8x128xf32>
      %c0_137 = arith.constant 0 : index
      %c0_138 = arith.constant 0 : index
      %350 = vector.load %arg8[%c0_137, %c0_138] : memref<8x128xf32, #tpu.memory_space<vmem>>, vector<8x128xf32>
      tpu.vector_store %arg8[%c0_137, %c0_138], %349 {strides = array<i32>} : memref<8x128xf32, #tpu.memory_space<vmem>>, vector<8x128xf32>,
    } else {
    }
    return
  }
  func.func @transform_0(%arg0: i32, %arg1: i32) -> (i32, i32, i32) {
    %c0_i32 = arith.constant 0 : i32
    %c0_i32_0 = arith.constant 0 : i32
    return %arg1, %arg0, %c0_i32 : i32, i32, i32
  }
  func.func @transform_1(%arg0: i32, %arg1: i32) -> (i32, i32) {
    %c0_i32 = arith.constant 0 : i32
    %c0_i32_0 = arith.constant 0 : i32
    %c0_i32_1 = arith.constant 0 : i32
    return %c0_i32, %c0_i32_0 : i32, i32
  }
  func.func @transform_2(%arg0: i32, %arg1: i32) -> (i32, i32) {
    %c0_i32 = arith.constant 0 : i32
    %c0_i32_0 = arith.constant 0 : i32
    %c0_i32_1 = arith.constant 0 : i32
    return %c0_i32, %c0_i32_0 : i32, i32
  }
  func.func @transform_3(%arg0: i32, %arg1: i32) -> (i32, i32) {
    %c0_i32 = arith.constant 0 : i32
    %c0_i32_0 = arith.constant 0 : i32
    %c0_i32_1 = arith.constant 0 : i32
    return %c0_i32, %c0_i32_0 : i32, i32
  }
  func.func @transform_4(%arg0: i32, %arg1: i32) -> (i32, i32) {
    %c0_i32 = arith.constant 0 : i32
    %c0_i32_0 = arith.constant 0 : i32
    %c0_i32_1 = arith.constant 0 : i32
    return %c0_i32, %c0_i32_0 : i32, i32
  }
  func.func @transform_5(%arg0: i32, %arg1: i32) -> (i32, i32) {
    %c0_i32 = arith.constant 0 : i32
    %c0_i32_0 = arith.constant 0 : i32
    %c0_i32_1 = arith.constant 0 : i32
    return %c0_i32, %c0_i32_0 : i32, i32
  }
  func.func @transform_6(%arg0: i32, %arg1: i32) -> (i32, i32) {
    %c0_i32 = arith.constant 0 : i32
    %c0_i32_0 = arith.constant 0 : i32
    return %arg0, %c0_i32 : i32, i32
  }
}

</mosaic_0001>

<bundles_post_ra>
// kernel: dplstm_forward.1
= control target key start
LH: loop header
LB: loop body
LE: loop exit
PB: predicated region body
PF: predicated region fallthrough
CT: control target
= control target key end

     0   :  { %v2673_v1 = vmov 0   ;;  %vm106_vm0 = vcmask 261120   ;;  %v1849_v45 = vmov 0.0|0.0   ;;  %v308_v46 = vlaneseq  ;;  %s2666_s1 = inlined_call_operand.vmem [shape: bf16[32,512], index: 1, kind: input, shape index: {}]   ;;  %s2667_s0 = inlined_call_operand.vmem [shape: bf16[8,8,32], index: 0, kind: input, shape index: {}]   ;;  %s2668_s2 = inlined_call_operand.vmem [shape: bf16[128,512], index: 2, kind: input, shape index: {}]   ;;  %s2669_s3 = inlined_call_operand.vmem [shape: f32[1,512], index: 3, kind: input, shape index: {}]   ;;  %s2670_s4 = inlined_call_operand.vmem [shape: bf16[128,128], index: 4, kind: input, shape index: {}]   ;;  %s2671_s5 = inlined_call_operand.vmem [shape: f32[1,128], index: 5, kind: input, shape index: {}]   ;;  %s2672_s6 = inlined_call_operand.vmem [shape: f32[8,128], index: 6, kind: output, shape index: {}]  }
   0x1   :  { %v1664_v0 = vld [vmem:[%s2666_s1 + $0x24] ss:$16 sps:$4 sm:$0xff]   ;;  %151 = vmatprep.mubr.bf16.mxu0 %v2673_v1  ;;  %224 = vmatprep.mubr.bf16.mxu1 %v2673_v1  ;;  %v1666_v2 = vld [vmem:[%s2666_s1 + $0x2c] ss:$16 sps:$4 sm:$0xff]   ;;  %v1668_v3 = vld [vmem:[%s2666_s1 + $0x20] ss:$16 sps:$4 sm:$0xff]  }
   0x2   :  { %131 = vmatprep.subr.bf16.mxu0 %v1664_v0  ;;  %v1669_v4 = vld [vmem:[%s2666_s1 + $0x28] ss:$16 sps:$4 sm:$0xff]   ;;  %204 = vmatprep.subr.bf16.mxu1 %v1666_v2  ;;  %v1670_v5 = vld [vmem:[%s2666_s1 + $0x4] ss:$16 sps:$4 sm:$0xff]   ;;  %v1672_v6 = vld [vmem:[%s2666_s1 + $0xc] ss:$16 sps:$4 sm:$0xff]  }
   0x3   :  { %132 = vmatpush1.bf16.msra.mxu0 %v1668_v3  ;;  %205 = vmatpush1.bf16.msra.mxu1 %v1669_v4  ;;  %v1674_v7 = vld [vmem:[%s2666_s1] ss:$16 sps:$4 sm:$0xff]   ;;  %v1675_v8 = vld [vmem:[%s2666_s1 + $0x8] ss:$16 sps:$4 sm:$0xff]   ;;  %v1919_v10 = vld [vmem:[%s2668_s2 + $0xe4] ss:$16 sps:$4 sm:$0xff]  }
   0x4   :  { %133 = vmatprep.subr.bf16.mxu0 %v1670_v5  ;;  %206 = vmatprep.subr.bf16.mxu1 %v1672_v6  ;;  %v1676_v9 = vld [vmem:[%s2667_s0] sm:$0xff]   ;;  %v1924_v11 = vld [vmem:[%s2668_s2 + $0xec] ss:$16 sps:$4 sm:$0xff]   ;;  %v1934_v13 = vld [vmem:[%s2668_s2 + $0xe8] ss:$16 sps:$4 sm:$0xff]   ;;  %v309_v47 = vshrl.u32 %v308_v46, 7 }
   0x5   :  { %v1929_v12 = vld [vmem:[%s2668_s2 + $0xe0] ss:$16 sps:$4 sm:$0xff]   ;;  %v1940_v14 = vld [vmem:[%s2668_s2 + $0xc4] ss:$16 sps:$4 sm:$0xff]   ;;  %v1946_v15 = vld [vmem:[%s2668_s2 + $0xcc] ss:$16 sps:$4 sm:$0xff]  }
   0x6   :  { %v1953_v16 = vld [vmem:[%s2668_s2 + $0xc0] ss:$16 sps:$4 sm:$0xff]   ;;  %v1960_v17 = vld [vmem:[%s2668_s2 + $0xc8] ss:$16 sps:$4 sm:$0xff]   ;;  %v1967_v18 = vld [vmem:[%s2668_s2 + $0xa4] ss:$16 sps:$4 sm:$0xff]  }
   0x7   :  { %134 = vmatpush1.bf16.msra.mxu0 %v1674_v7  ;;  %207 = vmatpush1.bf16.msra.mxu1 %v1675_v8  ;;  %v1689_v19 = vld [vmem:[%s2667_s0 + $0x8] sm:$0xff]   ;;  %v1982_v21 = vld [vmem:[%s2668_s2 + $0xa0] ss:$16 sps:$4 sm:$0xff]   ;;  %v1996_v23 = vld [vmem:[%s2668_s2 + $0x84] ss:$16 sps:$4 sm:$0xff]   ;;  %v318_v48 = vsub.s32 2, %v309_v47 }
   0x8   :  { %525 = vmatprep.subr.bf16.mxu0 %v1919_v10  ;;  %566 = vmatprep.subr.bf16.mxu1 %v1924_v11  ;;  %v1977_v20 = vld [vmem:[%s2668_s2 + $0xac] ss:$16 sps:$4 sm:$0xff]   ;;  %v1989_v22 = vld [vmem:[%s2668_s2 + $0xa8] ss:$16 sps:$4 sm:$0xff]   ;;  %v2008_v25 = vld [vmem:[%s2668_s2 + $0x80] ss:$16 sps:$4 sm:$0xff]  }
   0x9   :  { %v2001_v24 = vld [vmem:[%s2668_s2 + $0x8c] ss:$16 sps:$4 sm:$0xff]   ;;  %v2015_v26 = vld [vmem:[%s2668_s2 + $0x88] ss:$16 sps:$4 sm:$0xff]   ;;  %v2022_v27 = vld [vmem:[%s2668_s2 + $0x64] ss:$16 sps:$4 sm:$0xff]  }
   0xa   :  { %1582 = vmatmul.mubr.msk.bf16.vlgmr.msra.gmra.mxu0 %vm106_vm0, %v1676_v9  ;;  %1586 = vmatmul.mubr.msk.bf16.vlgmr.msra.gmra.mxu1 %vm106_vm0, %v1676_v9  ;;  %v2027_v28 = vld [vmem:[%s2668_s2 + $0x6c] ss:$16 sps:$4 sm:$0xff]   ;;  %v1702_v29 = vld [vmem:[%s2667_s0 + $0x10] sm:$0xff]   ;;  %v2042_v31 = vld [vmem:[%s2668_s2 + $0x68] ss:$16 sps:$4 sm:$0xff]   ;;  %v310_v49 = vsub.s32 0, %v309_v47 }
   0xb   :  { %526 = vmatpush1.bf16.msra.mxu0 %v1929_v12  ;;  %567 = vmatpush1.bf16.msra.mxu1 %v1934_v13  ;;  %v2037_v30 = vld [vmem:[%s2668_s2 + $0x60] ss:$16 sps:$4 sm:$0xff]   ;;  %v2049_v32 = vld [vmem:[%s2668_s2 + $0x44] ss:$16 sps:$4 sm:$0xff]   ;;  %v2056_v33 = vld [vmem:[%s2668_s2 + $0x4c] ss:$16 sps:$4 sm:$0xff]  }
   0xc   :  { %527 = vmatprep.subr.bf16.mxu0 %v1940_v14  ;;  %568 = vmatprep.subr.bf16.mxu1 %v1946_v15  ;;  %v2063_v34 = vld [vmem:[%s2668_s2 + $0x40] ss:$16 sps:$4 sm:$0xff]   ;;  %v2068_v35 = vld [vmem:[%s2668_s2 + $0x48] ss:$16 sps:$4 sm:$0xff]   ;;  %v2075_v36 = vld [vmem:[%s2668_s2 + $0x24] ss:$16 sps:$4 sm:$0xff]  }
   0xd   :  { %161 = vmatprep.mubr.bf16.mxu0 %v2673_v1  ;;  %234 = vmatprep.mubr.bf16.mxu1 %v2673_v1  ;;  %v2082_v37 = vld [vmem:[%s2668_s2 + $0x2c] ss:$16 sps:$4 sm:$0xff]   ;;  %v2094_v39 = vld [vmem:[%s2668_s2 + $0x20] ss:$16 sps:$4 sm:$0xff]   ;;  %v2099_v40 = vld [vmem:[%s2668_s2 + $0x28] ss:$16 sps:$4 sm:$0xff]  }
   0xe   :  { %v1715_v38 = vld [vmem:[%s2667_s0 + $0x18] sm:$0xff]   ;;  %v2106_v41 = vld [vmem:[%s2668_s2 + $0x4] ss:$16 sps:$4 sm:$0xff]   ;;  %v2120_v43 = vld [vmem:[%s2668_s2] ss:$16 sps:$4 sm:$0xff]   ;;  %v322_v50 = vsub.s32 3, %v309_v47 }
   0xf   :  { %528 = vmatpush1.bf16.msra.mxu0 %v1953_v16  ;;  %569 = vmatpush1.bf16.msra.mxu1 %v1960_v17  ;;  %v2111_v42 = vld [vmem:[%s2668_s2 + $0xc] ss:$16 sps:$4 sm:$0xff]   ;;  %v2125_v44 = vld [vmem:[%s2668_s2 + $0x8] ss:$16 sps:$4 sm:$0xff]   ;;  %v297_v52 = vld [vmem:[%s2669_s3] sm:$0xf] }
  0x10   :  { %529 = vmatprep.subr.bf16.mxu0 %v1967_v18  ;;  %570 = vmatprep.subr.bf16.mxu1 %v1977_v20  ;;  %v2176_v54 = vrot.slane %v297_v52, %v318_v48  ;;  %v314_v55 = vsub.s32 1, %v309_v47  ;;  %v311_v58 = vrot.slane %v297_v52, %v310_v49  ;;  %v2182_v59 = vrot.slane %v297_v52, %v322_v50 }
  0x11   :  { %vm1851_vm1 = vmmov 0  }
  0x12   :  { %1583 = vmatmul.mubr.msk.bf16.gmra.mxu0 %vm106_vm0, %v1689_v19  ;;  %1587 = vmatmul.mubr.msk.bf16.gmra.mxu1 %vm106_vm0, %v1689_v19  ;;  %v315_v62 = vrot.slane %v297_v52, %v314_v55 }
  0x13   :  { %530 = vmatpush1.bf16.msra.mxu0 %v1982_v21  ;;  %571 = vmatpush1.bf16.msra.mxu1 %v1989_v22 }
  0x14   :  { %531 = vmatprep.subr.bf16.mxu0 %v1996_v23  ;;  %572 = vmatprep.subr.bf16.mxu1 %v2001_v24 }
  0x15   :  { %171 = vmatprep.mubr.bf16.mxu0 %v2673_v1  ;;  %244 = vmatprep.mubr.bf16.mxu1 %v2673_v1 }
  0x17   :  { %532 = vmatpush1.bf16.msra.mxu0 %v2008_v25  ;;  %573 = vmatpush1.bf16.msra.mxu1 %v2015_v26 }
  0x18   :  { %533 = vmatprep.subr.bf16.mxu0 %v2022_v27  ;;  %574 = vmatprep.subr.bf16.mxu1 %v2027_v28 }
  0x1a   :  { %1584 = vmatmul.mubr.msk.bf16.gmra.mxu0 %vm106_vm0, %v1702_v29  ;;  %1588 = vmatmul.mubr.msk.bf16.gmra.mxu1 %vm106_vm0, %v1702_v29 }
  0x1b   :  { %534 = vmatpush1.bf16.msra.mxu0 %v2037_v30  ;;  %575 = vmatpush1.bf16.msra.mxu1 %v2042_v31 }
  0x1c   :  { %535 = vmatprep.subr.bf16.mxu0 %v2049_v32  ;;  %576 = vmatprep.subr.bf16.mxu1 %v2056_v33 }
  0x1d   :  { %181 = vmatprep.mubr.bf16.mxu0 %v2673_v1  ;;  %254 = vmatprep.mubr.bf16.mxu1 %v2673_v1 }
  0x1f   :  { %536 = vmatpush1.bf16.msra.mxu0 %v2063_v34  ;;  %577 = vmatpush1.bf16.msra.mxu1 %v2068_v35 }
  0x20   :  { %537 = vmatprep.subr.bf16.mxu0 %v2075_v36  ;;  %578 = vmatprep.subr.bf16.mxu1 %v2082_v37 }
  0x22   :  { %1585 = vmatmul.mubr.msk.bf16.gmra.mxu0 %vm106_vm0, %v1715_v38  ;;  %1589 = vmatmul.mubr.msk.bf16.gmra.mxu1 %vm106_vm0, %v1715_v38 }
  0x23   :  { %538 = vmatpush1.bf16.msra.mxu0 %v2094_v39  ;;  %579 = vmatpush1.bf16.msra.mxu1 %v2099_v40 }
  0x24   :  { %539 = vmatprep.subr.bf16.mxu0 %v2106_v41  ;;  %580 = vmatprep.subr.bf16.mxu1 %v2111_v42 }
  0x25   :  { %557 = vmatprep.mubr.bf16.mxu0 %v2673_v1  ;;  %598 = vmatprep.mubr.bf16.mxu1 %v2673_v1 }
  0x27   :  { %540 = vmatpush1.bf16.msra.mxu0 %v2120_v43  ;;  %581 = vmatpush1.bf16.msra.mxu1 %v2125_v44 }
  0x28   :  { %641 = vmatprep.subr.bf16.mxu0 %v1919_v10  ;;  %682 = vmatprep.subr.bf16.mxu1 %v1924_v11 }
  0x2a   :  { %558 = vmatmul.mubr.bf16.vlgmr.msra.gmra.mxu0 %v1849_v45  ;;  %599 = vmatmul.mubr.bf16.vlgmr.msra.gmra.mxu1 %v1849_v45 }
  0x2b   :  { %642 = vmatpush1.bf16.msra.mxu0 %v1929_v12  ;;  %683 = vmatpush1.bf16.msra.mxu1 %v1934_v13 }
  0x2c   :  { %643 = vmatprep.subr.bf16.mxu0 %v1940_v14  ;;  %684 = vmatprep.subr.bf16.mxu1 %v1946_v15 }
  0x2d   :  { %673 = vmatprep.mubr.bf16.mxu0 %v2673_v1  ;;  %714 = vmatprep.mubr.bf16.mxu1 %v2673_v1 }
  0x2f   :  { %644 = vmatpush1.bf16.msra.mxu0 %v1953_v16  ;;  %685 = vmatpush1.bf16.msra.mxu1 %v1960_v17 }
  0x30   :  { %645 = vmatprep.subr.bf16.mxu0 %v1967_v18  ;;  %686 = vmatprep.subr.bf16.mxu1 %v1977_v20 }
  0x33   :  { %646 = vmatpush1.bf16.msra.mxu0 %v1982_v21  ;;  %687 = vmatpush1.bf16.msra.mxu1 %v1989_v22 }
  0x34   :  { %647 = vmatprep.subr.bf16.mxu0 %v1996_v23  ;;  %688 = vmatprep.subr.bf16.mxu1 %v2001_v24 }
  0x37   :  { %648 = vmatpush1.bf16.msra.mxu0 %v2008_v25  ;;  %689 = vmatpush1.bf16.msra.mxu1 %v2015_v26 }
  0x38   :  { %649 = vmatprep.subr.bf16.mxu0 %v2022_v27  ;;  %690 = vmatprep.subr.bf16.mxu1 %v2027_v28 }
  0x3b   :  { %650 = vmatpush1.bf16.msra.mxu0 %v2037_v30  ;;  %691 = vmatpush1.bf16.msra.mxu1 %v2042_v31 }
  0x3c   :  { %651 = vmatprep.subr.bf16.mxu0 %v2049_v32  ;;  %692 = vmatprep.subr.bf16.mxu1 %v2056_v33 }
  0x3f   :  { %652 = vmatpush1.bf16.msra.mxu0 %v2063_v34  ;;  %693 = vmatpush1.bf16.msra.mxu1 %v2068_v35 }
  0x40   :  { %653 = vmatprep.subr.bf16.mxu0 %v2075_v36  ;;  %694 = vmatprep.subr.bf16.mxu1 %v2082_v37 }
  0x43   :  { %654 = vmatpush1.bf16.msra.mxu0 %v2094_v39  ;;  %695 = vmatpush1.bf16.msra.mxu1 %v2099_v40 }
  0x44   :  { %655 = vmatprep.subr.bf16.mxu0 %v2106_v41  ;;  %696 = vmatprep.subr.bf16.mxu1 %v2111_v42 }
  0x47   :  { %656 = vmatpush1.bf16.msra.mxu0 %v2120_v43  ;;  %697 = vmatpush1.bf16.msra.mxu1 %v2125_v44 }
  0x48   :  { %757 = vmatprep.subr.bf16.mxu0 %v1919_v10  ;;  %798 = vmatprep.subr.bf16.mxu1 %v1924_v11 }
  0xca   :  { %v2169_v51 = vpop.f32.mrf.mxu0  ;;  %v2174_v53 = vpop.f32.mrf.mxu1 }
  0xcc   :  { %v2178_v56 = vpop.f32.mrf.mxu0  ;;  %v2180_v57 = vpop.f32.mrf.mxu1 }
  0xce   :  { %v157_v60 = vpop.f32.mrf.mxu0  ;;  %v230_v61 = vpop.f32.mrf.mxu1 }
  0xcf   :  { %v2184_v63 = vadd.f32 %v311_v58, %v157_v60  ;;  %v2187_v0 = vadd.f32 %v2176_v54, %v230_v61 }
  0xd0   :  { %v159_v2 = vpop.f32.mrf.mxu0  ;;  %v232_v3 = vpop.f32.mrf.mxu1 }
  0xd1   :  { %v2189_v4 = vadd.f32 %v315_v62, %v159_v2  ;;  %v2192_v5 = vadd.f32 %v2182_v59, %v232_v3 }
  0xd2   :  { %v163_v6 = vpop.f32.mrf.mxu0  ;;  %v236_v7 = vpop.f32.mrf.mxu1 }
  0xd3   :  { %v2194_v8 = vadd.f32 %v311_v58, %v163_v6  ;;  %v2197_v9 = vadd.f32 %v2176_v54, %v236_v7 }
  0xd4   :  { %v165_v19 = vpop.f32.mrf.mxu0  ;;  %v238_v29 = vpop.f32.mrf.mxu1 }
  0xd5   :  { %v2199_v38 = vadd.f32 %v315_v62, %v165_v19  ;;  %v2202_v45 = vadd.f32 %v2182_v59, %v238_v29 }
  0xd6   :  { %v167_v46 = vpop.f32.mrf.mxu0  ;;  %v240_v47 = vpop.f32.mrf.mxu1 }
  0xd7   :  { %v2204_v48 = vadd.f32 %v311_v58, %v167_v46  ;;  %v2207_v49 = vadd.f32 %v2176_v54, %v240_v47 }
  0xd8   :  { %v169_v50 = vpop.f32.mrf.mxu0  ;;  %v242_v52 = vpop.f32.mrf.mxu1 }
  0xd9   :  { %2675 = vst [vmem:[#allocation5_spill] sm:$0xff] %v2204_v48  ;;  %2676 = vst [vmem:[#allocation6_spill] sm:$0xff] %v2207_v49  ;;  %v2209_v55 = vadd.f32 %v315_v62, %v169_v50  ;;  %v2212_v60 = vadd.f32 %v2182_v59, %v242_v52  ;;  %v330_v48 = vadd.f32 %v2176_v54, %v2174_v53 }
  0xda   :  { %v173_v61 = vpop.f32.mrf.mxu0  ;;  %v246_v2 = vpop.f32.mrf.mxu1 }
  0xdb   :  { %2677 = vst [vmem:[#allocation7_spill] sm:$0xff] %v2209_v55  ;;  %2678 = vst [vmem:[#allocation8_spill] sm:$0xff] %v2212_v60  ;;  %v2214_v3 = vadd.f32 %v311_v58, %v173_v61  ;;  %v2217_v6 = vadd.f32 %v2176_v54, %v246_v2 }
  0xdc   :  { %v175_v7 = vpop.f32.mrf.mxu0  ;;  %v248_v19 = vpop.f32.mrf.mxu1 }
  0xdd   :  { %2679 = vst [vmem:[#allocation9_spill] sm:$0xff] %v2214_v3  ;;  %2680 = vst [vmem:[#allocation10_spill] sm:$0xff] %v2217_v6  ;;  %v2219_v29 = vadd.f32 %v315_v62, %v175_v7  ;;  %v2222_v46 = vadd.f32 %v2182_v59, %v248_v19 }
  0xde   :  { %v177_v47 = vpop.f32.mrf.mxu0  ;;  %v250_v50 = vpop.f32.mrf.mxu1 }
  0xdf   :  { %2681 = vst [vmem:[#allocation11_spill] sm:$0xff] %v2219_v29  ;;  %2682 = vst [vmem:[#allocation12_spill] sm:$0xff] %v2222_v46  ;;  %v2224_v1 = vadd.f32 %v311_v58, %v177_v47  ;;  %v2227_v52 = vadd.f32 %v2176_v54, %v250_v50 }
  0xe0   :  { %v179_v60 = vpop.f32.mrf.mxu0  ;;  %v252_v61 = vpop.f32.mrf.mxu1 }
  0xe1   :  { %2683 = vst [vmem:[#allocation13_spill] sm:$0xff] %v2224_v1  ;;  %2684 = vst [vmem:[#allocation14_spill] sm:$0xff] %v2227_v52  ;;  %v2229_v3 = vadd.f32 %v315_v62, %v179_v60  ;;  %v2232_v2 = vadd.f32 %v2182_v59, %v252_v61 }
  0xe2   :  { %v183_v6 = vpop.f32.mrf.mxu0  ;;  %v256_v7 = vpop.f32.mrf.mxu1 }
  0xe3   :  { %2685 = vst [vmem:[#allocation15_spill] sm:$0xff] %v2229_v3  ;;  %2686 = vst [vmem:[#allocation16_spill] sm:$0xff] %v2232_v2  ;;  %v2234_v29 = vadd.f32 %v311_v58, %v183_v6  ;;  %v2237_v19 = vadd.f32 %v2176_v54, %v256_v7 }
  0xe4   :  { %v185_v46 = vpop.f32.mrf.mxu0  ;;  %v258_v47 = vpop.f32.mrf.mxu1 }
  0xe5   :  { %2687 = vst [vmem:[#allocation17_spill] sm:$0xff] %v2234_v29  ;;  %2688 = vst [vmem:[#allocation18_spill] sm:$0xff] %v2237_v19  ;;  %v2239_v1 = vadd.f32 %v315_v62, %v185_v46  ;;  %v2242_v50 = vadd.f32 %v2182_v59, %v258_v47  ;;  %v328_v29 = vadd.f32 %v311_v58, %v2169_v51 }
  0xe6   :  { %v187_v52 = vpop.f32.mrf.mxu0  ;;  %v260_v60 = vpop.f32.mrf.mxu1  ;;  %v329_v47 = vadd.f32 %v315_v62, %v2178_v56 }
  0xe7   :  { %2689 = vst [vmem:[#allocation19_spill] sm:$0xff] %v2239_v1  ;;  %2690 = vst [vmem:[#allocation20_spill] sm:$0xff] %v2242_v50  ;;  %v2244_v3 = vadd.f32 %v311_v58, %v187_v52  ;;  %v2247_v61 = vadd.f32 %v2176_v54, %v260_v60 }
  0xe8   :  { %v189_v2 = vpop.f32.mrf.mxu0  ;;  %v262_v6 = vpop.f32.mrf.mxu1 }
  0xe9   :  { %2691 = vst [vmem:[#allocation21_spill] sm:$0xff] %v2244_v3  ;;  %2692 = vst [vmem:[#allocation22_spill] sm:$0xff] %v2247_v61  ;;  %v2250_v7 = vadd.f32 %v315_v62, %v189_v2  ;;  %v2253_v19 = vadd.f32 %v2182_v59, %v262_v6 }
  0xea   :  { %v559_v46 = vpop.f32.mrf.mxu0  ;;  %v600_v1 = vpop.f32.mrf.mxu1 }
  0xeb   :  { %2693 = vst [vmem:[#allocation23_spill] sm:$0xff] %v2253_v19  ;;  %v607_v50 = vadd.f32 %v559_v46, %v328_v29  ;;  %v609_v6 = vadd.f32 %v600_v1, %v330_v48  ;;  %v331_v19 = vadd.f32 %v2182_v59, %v2180_v57 }
  0xec   :  { %v561_v49 = vpop.f32.mrf.mxu0  ;;  %v602_v52 = vpop.f32.mrf.mxu1 }
  0xed   :  { %v611_v3 = vmul.f32 0.5, %v607_v50  ;;  %v608_v55 = vadd.f32 %v561_v49, %v329_v47  ;;  %v610_v56 = vadd.f32 %v602_v52, %v331_v19 }
  0xee   :  { %v563_v60 = vpop.f32.mrf.mxu0  ;;  %v604_v61 = vpop.f32.mrf.mxu1 }
  0xef   :  { %1736 = vtanh.f32 %v611_v3  ;;  %v615_v51 = vmul.f32 0.5, %v608_v55  ;;  %v620_v62 = vmul.f32 0.5, %v610_v56  ;;  %v2694_v60 = vmov 0  }
  0xf0   :  { %v564_v58 = vpop.f32.mrf.mxu0  ;;  %v605_v2 = vpop.f32.mrf.mxu1 }
  0xf1   :  { %1738 = vtanh.f32 %v615_v51 }
  0xf2   :  { %1740 = vtanh.f32 %v609_v6 }
  0xf3   :  { %1742 = vtanh.f32 %v620_v62 }
  0xfc   :  { %v1737_v29 = vpop.eup %1736 }
  0xfd   :  { %v613_v50 = vmul.f32 0.5, %v1737_v29 }
  0xfe   :  { %v1739_v49 = vpop.eup %1738 }
  0xff   :  { %v614_v46 = vadd.f32 0.5, %v613_v50  ;;  %v617_v61 = vmul.f32 0.5, %v1739_v49  ;;  %v1741_v53 = vpop.eup %1740 }
 0x100   :  { %v1743_v1 = vpop.eup %1742 }
 0x101   :  { %v618_v47 = vadd.f32 0.5, %v617_v61  ;;  %v625_v55 = vmul.f32 %v1741_v53, %v614_v46  ;;  %v622_v48 = vmul.f32 0.5, %v1743_v1 }
 0x103   :  { %v624_v54 = vmul.f32 0.0, %v618_v47  ;;  %v623_v57 = vadd.f32 0.5, %v622_v48 }
 0x105   :  { %v2260_v3 = vadd.f32 %v625_v55, %v624_v54 }
 0x107   :  { %1744 = vtanh.f32 %v2260_v3 }
 0x114   :  { %v1745_v59 = vpop.eup %1744 }
 0x115   :  { %v628_v19 = vmul.f32 %v1745_v59, %v623_v57 }
 0x117   :  { %v640_v52 = vpack.c.bf16 %v628_v19, %v628_v19 }
 0x119   :  { %674 = vmatmul.mubr.bf16.vlgmr.msra.gmra.mxu0 %v640_v52  ;;  %715 = vmatmul.mubr.bf16.vlgmr.msra.gmra.mxu1 %v640_v52 }
 0x11a   :  { %758 = vmatpush1.bf16.msra.mxu0 %v1929_v12  ;;  %799 = vmatpush1.bf16.msra.mxu1 %v1934_v13 }
 0x11b   :  { %759 = vmatprep.subr.bf16.mxu0 %v1940_v14  ;;  %800 = vmatprep.subr.bf16.mxu1 %v1946_v15 }
 0x11c   :  { %789 = vmatprep.mubr.bf16.mxu0 %v2694_v60  ;;  %830 = vmatprep.mubr.bf16.mxu1 %v2694_v60 }
 0x11e   :  { %760 = vmatpush1.bf16.msra.mxu0 %v1953_v16  ;;  %801 = vmatpush1.bf16.msra.mxu1 %v1960_v17 }
 0x11f   :  { %761 = vmatprep.subr.bf16.mxu0 %v1967_v18  ;;  %802 = vmatprep.subr.bf16.mxu1 %v1977_v20 }
 0x122   :  { %762 = vmatpush1.bf16.msra.mxu0 %v1982_v21  ;;  %803 = vmatpush1.bf16.msra.mxu1 %v1989_v22 }
 0x123   :  { %763 = vmatprep.subr.bf16.mxu0 %v1996_v23  ;;  %804 = vmatprep.subr.bf16.mxu1 %v2001_v24 }
 0x126   :  { %764 = vmatpush1.bf16.msra.mxu0 %v2008_v25  ;;  %805 = vmatpush1.bf16.msra.mxu1 %v2015_v26 }
 0x127   :  { %765 = vmatprep.subr.bf16.mxu0 %v2022_v27  ;;  %806 = vmatprep.subr.bf16.mxu1 %v2027_v28 }
 0x12a   :  { %766 = vmatpush1.bf16.msra.mxu0 %v2037_v30  ;;  %807 = vmatpush1.bf16.msra.mxu1 %v2042_v31 }
 0x12b   :  { %767 = vmatprep.subr.bf16.mxu0 %v2049_v32  ;;  %808 = vmatprep.subr.bf16.mxu1 %v2056_v33 }
 0x12e   :  { %768 = vmatpush1.bf16.msra.mxu0 %v2063_v34  ;;  %809 = vmatpush1.bf16.msra.mxu1 %v2068_v35 }
 0x12f   :  { %769 = vmatprep.subr.bf16.mxu0 %v2075_v36  ;;  %810 = vmatprep.subr.bf16.mxu1 %v2082_v37 }
 0x132   :  { %770 = vmatpush1.bf16.msra.mxu0 %v2094_v39  ;;  %811 = vmatpush1.bf16.msra.mxu1 %v2099_v40 }
 0x133   :  { %771 = vmatprep.subr.bf16.mxu0 %v2106_v41  ;;  %812 = vmatprep.subr.bf16.mxu1 %v2111_v42 }
 0x136   :  { %772 = vmatpush1.bf16.msra.mxu0 %v2120_v43  ;;  %813 = vmatpush1.bf16.msra.mxu1 %v2125_v44 }
 0x137   :  { %873 = vmatprep.subr.bf16.mxu0 %v1919_v10  ;;  %914 = vmatprep.subr.bf16.mxu1 %v1924_v11 }
 0x1d9   :  { %v675_v51 = vpop.f32.mrf.mxu0  ;;  %v716_v58 = vpop.f32.mrf.mxu1 }
 0x1da   :  { %v723_v2 = vadd.f32 %v675_v51, %v2184_v63  ;;  %v725_v46 = vadd.f32 %v716_v58, %v2187_v0 }
 0x1db   :  { %v677_v6 = vpop.f32.mrf.mxu0  ;;  %v718_v56 = vpop.f32.mrf.mxu1 }
 0x1dc   :  { %v727_v62 = vmul.f32 0.5, %v723_v2  ;;  %v724_v29 = vadd.f32 %v677_v6, %v2189_v4  ;;  %v726_v54 = vadd.f32 %v718_v56, %v2192_v5 }
 0x1dd   :  { %v679_v50 = vpop.f32.mrf.mxu0  ;;  %v720_v49 = vpop.f32.mrf.mxu1 }
 0x1de   :  { %1746 = vtanh.f32 %v727_v62  ;;  %v731_v61 = vmul.f32 0.5, %v724_v29  ;;  %v736_v55 = vmul.f32 0.5, %v726_v54 }
 0x1df   :  { %v680_v47 = vpop.f32.mrf.mxu0  ;;  %v721_v53 = vpop.f32.mrf.mxu1 }
 0x1e0   :  { %1748 = vtanh.f32 %v731_v61 }
 0x1e1   :  { %1750 = vtanh.f32 %v725_v46 }
 0x1e2   :  { %1752 = vtanh.f32 %v736_v55 }
 0x1eb   :  { %v1747_v1 = vpop.eup %1746 }
 0x1ec   :  { %v729_v63 = vmul.f32 0.5, %v1747_v1 }
 0x1ed   :  { %v1749_v48 = vpop.eup %1748 }
 0x1ee   :  { %v730_v57 = vadd.f32 0.5, %v729_v63  ;;  %v733_v59 = vmul.f32 0.5, %v1749_v48  ;;  %v1751_v4 = vpop.eup %1750 }
 0x1ef   :  { %v1753_v58 = vpop.eup %1752 }
 0x1f0   :  { %v734_v19 = vadd.f32 0.5, %v733_v59  ;;  %v741_v52 = vmul.f32 %v1751_v4, %v730_v57  ;;  %v738_v2 = vmul.f32 0.5, %v1753_v58 }
 0x1f2   :  { %v740_v51 = vmul.f32 %v734_v19, %v2260_v3  ;;  %v739_v6 = vadd.f32 0.5, %v738_v2 }
 0x1f4   :  { %v2302_v0 = vadd.f32 %v741_v52, %v740_v51 }
 0x1f6   :  { %1754 = vtanh.f32 %v2302_v0 }
 0x203   :  { %v1755_v5 = vpop.eup %1754 }
 0x204   :  { %v744_v56 = vmul.f32 %v1755_v5, %v739_v6 }
 0x206   :  { %v756_v62 = vpack.c.bf16 %v744_v56, %v744_v56 }
 0x208   :  { %790 = vmatmul.mubr.bf16.vlgmr.msra.gmra.mxu0 %v756_v62  ;;  %831 = vmatmul.mubr.bf16.vlgmr.msra.gmra.mxu1 %v756_v62 }
 0x209   :  { %874 = vmatpush1.bf16.msra.mxu0 %v1929_v12  ;;  %915 = vmatpush1.bf16.msra.mxu1 %v1934_v13 }
 0x20a   :  { %875 = vmatprep.subr.bf16.mxu0 %v1940_v14  ;;  %916 = vmatprep.subr.bf16.mxu1 %v1946_v15 }
 0x20b   :  { %905 = vmatprep.mubr.bf16.mxu0 %v2694_v60  ;;  %946 = vmatprep.mubr.bf16.mxu1 %v2694_v60 }
 0x20d   :  { %876 = vmatpush1.bf16.msra.mxu0 %v1953_v16  ;;  %917 = vmatpush1.bf16.msra.mxu1 %v1960_v17 }
 0x20e   :  { %877 = vmatprep.subr.bf16.mxu0 %v1967_v18  ;;  %918 = vmatprep.subr.bf16.mxu1 %v1977_v20 }
 0x211   :  { %878 = vmatpush1.bf16.msra.mxu0 %v1982_v21  ;;  %919 = vmatpush1.bf16.msra.mxu1 %v1989_v22 }
 0x212   :  { %879 = vmatprep.subr.bf16.mxu0 %v1996_v23  ;;  %920 = vmatprep.subr.bf16.mxu1 %v2001_v24 }
 0x215   :  { %880 = vmatpush1.bf16.msra.mxu0 %v2008_v25  ;;  %921 = vmatpush1.bf16.msra.mxu1 %v2015_v26 }
 0x216   :  { %881 = vmatprep.subr.bf16.mxu0 %v2022_v27  ;;  %922 = vmatprep.subr.bf16.mxu1 %v2027_v28 }
 0x219   :  { %882 = vmatpush1.bf16.msra.mxu0 %v2037_v30  ;;  %923 = vmatpush1.bf16.msra.mxu1 %v2042_v31 }
 0x21a   :  { %883 = vmatprep.subr.bf16.mxu0 %v2049_v32  ;;  %924 = vmatprep.subr.bf16.mxu1 %v2056_v33 }
 0x21d   :  { %884 = vmatpush1.bf16.msra.mxu0 %v2063_v34  ;;  %925 = vmatpush1.bf16.msra.mxu1 %v2068_v35 }
 0x21e   :  { %885 = vmatprep.subr.bf16.mxu0 %v2075_v36  ;;  %926 = vmatprep.subr.bf16.mxu1 %v2082_v37 }
 0x221   :  { %886 = vmatpush1.bf16.msra.mxu0 %v2094_v39  ;;  %927 = vmatpush1.bf16.msra.mxu1 %v2099_v40 }
 0x222   :  { %887 = vmatprep.subr.bf16.mxu0 %v2106_v41  ;;  %928 = vmatprep.subr.bf16.mxu1 %v2111_v42 }
 0x225   :  { %888 = vmatpush1.bf16.msra.mxu0 %v2120_v43  ;;  %929 = vmatpush1.bf16.msra.mxu1 %v2125_v44 }
 0x226   :  { %989 = vmatprep.subr.bf16.mxu0 %v1919_v10  ;;  %1030 = vmatprep.subr.bf16.mxu1 %v1924_v11 }
 0x2c8   :  { %v791_v3 = vpop.f32.mrf.mxu0  ;;  %v832_v29 = vpop.f32.mrf.mxu1 }
 0x2c9   :  { %v839_v50 = vadd.f32 %v791_v3, %v2194_v8  ;;  %v841_v55 = vadd.f32 %v832_v29, %v2197_v9 }
 0x2ca   :  { %v793_v49 = vpop.f32.mrf.mxu0  ;;  %v834_v46 = vpop.f32.mrf.mxu1 }
 0x2cb   :  { %v843_v61 = vmul.f32 0.5, %v839_v50  ;;  %v840_v47 = vadd.f32 %v793_v49, %v2199_v38  ;;  %v842_v57 = vadd.f32 %v834_v46, %v2202_v45  ;;  %v2695_v49 = vld [vmem:[#allocation5_spill] sm:$0xff] }
 0x2cc   :  { %v795_v53 = vpop.f32.mrf.mxu0  ;;  %v836_v54 = vpop.f32.mrf.mxu1 }
 0x2cd   :  { %1756 = vtanh.f32 %v843_v61  ;;  %v847_v1 = vmul.f32 0.5, %v840_v47  ;;  %v852_v59 = vmul.f32 0.5, %v842_v57  ;;  %v2696_v54 = vld [vmem:[#allocation7_spill] sm:$0xff] }
 0x2ce   :  { %v796_v63 = vpop.f32.mrf.mxu0  ;;  %v837_v48 = vpop.f32.mrf.mxu1 }
 0x2cf   :  { %1758 = vtanh.f32 %v847_v1  ;;  %v2697_v48 = vld [vmem:[#allocation6_spill] sm:$0xff] }
 0x2d0   :  { %1760 = vtanh.f32 %v841_v55 }
 0x2d1   :  { %1762 = vtanh.f32 %v852_v59 }
 0x2da   :  { %v1757_v4 = vpop.eup %1756 }
 0x2db   :  { %v845_v8 = vmul.f32 0.5, %v1757_v4 }
 0x2dc   :  { %v1759_v19 = vpop.eup %1758 }
 0x2dd   :  { %v846_v52 = vadd.f32 0.5, %v845_v8  ;;  %v849_v51 = vmul.f32 0.5, %v1759_v19  ;;  %v1761_v38 = vpop.eup %1760 }
 0x2de   :  { %v1763_v5 = vpop.eup %1762 }
 0x2df   :  { %v850_v58 = vadd.f32 0.5, %v849_v51  ;;  %v857_v2 = vmul.f32 %v1761_v38, %v846_v52  ;;  %v854_v56 = vmul.f32 0.5, %v1763_v5 }
 0x2e1   :  { %v856_v6 = vmul.f32 %v850_v58, %v2302_v0  ;;  %v855_v62 = vadd.f32 0.5, %v854_v56 }
 0x2e3   :  { %v2344_v9 = vadd.f32 %v857_v2, %v856_v6 }
 0x2e5   :  { %1764 = vtanh.f32 %v2344_v9 }
 0x2f2   :  { %v1765_v45 = vpop.eup %1764 }
 0x2f3   :  { %v860_v3 = vmul.f32 %v1765_v45, %v855_v62 }
 0x2f5   :  { %v872_v29 = vpack.c.bf16 %v860_v3, %v860_v3 }
 0x2f7   :  { %906 = vmatmul.mubr.bf16.vlgmr.msra.gmra.mxu0 %v872_v29  ;;  %947 = vmatmul.mubr.bf16.vlgmr.msra.gmra.mxu1 %v872_v29 }
 0x2f8   :  { %990 = vmatpush1.bf16.msra.mxu0 %v1929_v12  ;;  %1031 = vmatpush1.bf16.msra.mxu1 %v1934_v13 }
 0x2f9   :  { %991 = vmatprep.subr.bf16.mxu0 %v1940_v14  ;;  %1032 = vmatprep.subr.bf16.mxu1 %v1946_v15 }
 0x2fa   :  { %1021 = vmatprep.mubr.bf16.mxu0 %v2694_v60  ;;  %1062 = vmatprep.mubr.bf16.mxu1 %v2694_v60 }
 0x2fc   :  { %992 = vmatpush1.bf16.msra.mxu0 %v1953_v16  ;;  %1033 = vmatpush1.bf16.msra.mxu1 %v1960_v17 }
 0x2fd   :  { %993 = vmatprep.subr.bf16.mxu0 %v1967_v18  ;;  %1034 = vmatprep.subr.bf16.mxu1 %v1977_v20 }
 0x300   :  { %994 = vmatpush1.bf16.msra.mxu0 %v1982_v21  ;;  %1035 = vmatpush1.bf16.msra.mxu1 %v1989_v22 }
 0x301   :  { %995 = vmatprep.subr.bf16.mxu0 %v1996_v23  ;;  %1036 = vmatprep.subr.bf16.mxu1 %v2001_v24 }
 0x304   :  { %996 = vmatpush1.bf16.msra.mxu0 %v2008_v25  ;;  %1037 = vmatpush1.bf16.msra.mxu1 %v2015_v26 }
 0x305   :  { %997 = vmatprep.subr.bf16.mxu0 %v2022_v27  ;;  %1038 = vmatprep.subr.bf16.mxu1 %v2027_v28 }
 0x308   :  { %998 = vmatpush1.bf16.msra.mxu0 %v2037_v30  ;;  %1039 = vmatpush1.bf16.msra.mxu1 %v2042_v31 }
 0x309   :  { %999 = vmatprep.subr.bf16.mxu0 %v2049_v32  ;;  %1040 = vmatprep.subr.bf16.mxu1 %v2056_v33 }
 0x30c   :  { %1000 = vmatpush1.bf16.msra.mxu0 %v2063_v34  ;;  %1041 = vmatpush1.bf16.msra.mxu1 %v2068_v35 }
 0x30d   :  { %1001 = vmatprep.subr.bf16.mxu0 %v2075_v36  ;;  %1042 = vmatprep.subr.bf16.mxu1 %v2082_v37 }
 0x310   :  { %1002 = vmatpush1.bf16.msra.mxu0 %v2094_v39  ;;  %1043 = vmatpush1.bf16.msra.mxu1 %v2099_v40 }
 0x311   :  { %1003 = vmatprep.subr.bf16.mxu0 %v2106_v41  ;;  %1044 = vmatprep.subr.bf16.mxu1 %v2111_v42 }
 0x314   :  { %1004 = vmatpush1.bf16.msra.mxu0 %v2120_v43  ;;  %1045 = vmatpush1.bf16.msra.mxu1 %v2125_v44 }
 0x315   :  { %1105 = vmatprep.subr.bf16.mxu0 %v1919_v10  ;;  %1146 = vmatprep.subr.bf16.mxu1 %v1924_v11  ;;  %v2698_v10 = vld [vmem:[#allocation8_spill] sm:$0xff] }
 0x3b7   :  { %v907_v0 = vpop.f32.mrf.mxu0  ;;  %v948_v50 = vpop.f32.mrf.mxu1 }
 0x3b8   :  { %v955_v46 = vadd.f32 %v907_v0, %v2695_v49  ;;  %v957_v57 = vadd.f32 %v948_v50, %v2697_v48 }
 0x3b9   :  { %v909_v61 = vpop.f32.mrf.mxu0  ;;  %v950_v47 = vpop.f32.mrf.mxu1 }
 0x3ba   :  { %v959_v53 = vmul.f32 0.5, %v955_v46  ;;  %v956_v55 = vadd.f32 %v909_v61, %v2696_v54  ;;  %v958_v11 = vadd.f32 %v950_v47, %v2698_v10  ;;  %v2702_v47 = vld [vmem:[#allocation12_spill] sm:$0xff] }
 0x3bb   :  { %v911_v1 = vpop.f32.mrf.mxu0  ;;  %v952_v63 = vpop.f32.mrf.mxu1 }
 0x3bc   :  { %1766 = vtanh.f32 %v959_v53  ;;  %v963_v59 = vmul.f32 0.5, %v956_v55  ;;  %v968_v19 = vmul.f32 0.5, %v958_v11 }
 0x3bd   :  { %v912_v4 = vpop.f32.mrf.mxu0  ;;  %v953_v8 = vpop.f32.mrf.mxu1 }
 0x3be   :  { %1768 = vtanh.f32 %v963_v59 }
 0x3bf   :  { %1770 = vtanh.f32 %v957_v57 }
 0x3c0   :  { %1772 = vtanh.f32 %v968_v19 }
 0x3c9   :  { %v1767_v52 = vpop.eup %1766 }
 0x3ca   :  { %v961_v51 = vmul.f32 0.5, %v1767_v52 }
 0x3cb   :  { %v1769_v38 = vpop.eup %1768 }
 0x3cc   :  { %v962_v58 = vadd.f32 0.5, %v961_v51  ;;  %v965_v2 = vmul.f32 0.5, %v1769_v38  ;;  %v1771_v6 = vpop.eup %1770 }
 0x3cd   :  { %v1773_v3 = vpop.eup %1772 }
 0x3ce   :  { %v966_v5 = vadd.f32 0.5, %v965_v2  ;;  %v973_v56 = vmul.f32 %v1771_v6, %v962_v58  ;;  %v970_v29 = vmul.f32 0.5, %v1773_v3  ;;  %v2444_v6 = vld [vmem:[%s2668_s2 + $0xe0] ss:$16 sps:$4 sm:$0xff]   ;;  %v2476_v3 = vld [vmem:[%s2668_s2 + $0xc8] ss:$16 sps:$4 sm:$0xff]  }
 0x3d0   :  { %v972_v62 = vmul.f32 %v966_v5, %v2344_v9  ;;  %v971_v0 = vadd.f32 0.5, %v970_v29  ;;  %v2450_v5 = vld [vmem:[%s2668_s2 + $0xe8] ss:$16 sps:$4 sm:$0xff]   ;;  %v2482_v29 = vld [vmem:[%s2668_s2 + $0xa4] ss:$16 sps:$4 sm:$0xff]  }
 0x3d2   :  { %v2386_v45 = vadd.f32 %v973_v56, %v972_v62  ;;  %v2456_v56 = vld [vmem:[%s2668_s2 + $0xc4] ss:$16 sps:$4 sm:$0xff]   ;;  %v2462_v62 = vld [vmem:[%s2668_s2 + $0xcc] ss:$16 sps:$4 sm:$0xff]  }
 0x3d4   :  { %1774 = vtanh.f32 %v2386_v45 }
 0x3e1   :  { %v1775_v50 = vpop.eup %1774 }
 0x3e2   :  { %v976_v49 = vmul.f32 %v1775_v50, %v971_v0  ;;  %v2488_v0 = vld [vmem:[%s2668_s2 + $0xac] ss:$16 sps:$4 sm:$0xff]   ;;  %v2494_v50 = vld [vmem:[%s2668_s2 + $0xa0] ss:$16 sps:$4 sm:$0xff]  }
 0x3e4   :  { %v988_v46 = vpack.c.bf16 %v976_v49, %v976_v49  ;;  %v2500_v49 = vld [vmem:[%s2668_s2 + $0xa8] ss:$16 sps:$4 sm:$0xff]  }
 0x3e6   :  { %1022 = vmatmul.mubr.bf16.vlgmr.msra.gmra.mxu0 %v988_v46  ;;  %1063 = vmatmul.mubr.bf16.vlgmr.msra.gmra.mxu1 %v988_v46  ;;  %v2506_v46 = vld [vmem:[%s2668_s2 + $0x84] ss:$16 sps:$4 sm:$0xff]  }
 0x3e7   :  { %1106 = vmatpush1.bf16.msra.mxu0 %v1929_v12  ;;  %1147 = vmatpush1.bf16.msra.mxu1 %v1934_v13  ;;  %v2424_v12 = vld [vmem:[%s2668_s2 + $0xe4] ss:$16 sps:$4 sm:$0xff]   ;;  %v2430_v13 = vld [vmem:[%s2668_s2 + $0xec] ss:$16 sps:$4 sm:$0xff]  }
 0x3e8   :  { %1107 = vmatprep.subr.bf16.mxu0 %v1940_v14  ;;  %1148 = vmatprep.subr.bf16.mxu1 %v1946_v15 }
 0x3e9   :  { %1137 = vmatprep.mubr.bf16.mxu0 %v2694_v60  ;;  %1178 = vmatprep.mubr.bf16.mxu1 %v2694_v60 }
 0x3eb   :  { %1108 = vmatpush1.bf16.msra.mxu0 %v1953_v16  ;;  %1149 = vmatpush1.bf16.msra.mxu1 %v1960_v17  ;;  %v2699_v16 = vld [vmem:[#allocation9_spill] sm:$0xff] }
 0x3ec   :  { %1109 = vmatprep.subr.bf16.mxu0 %v1967_v18  ;;  %1150 = vmatprep.subr.bf16.mxu1 %v1977_v20 }
 0x3ef   :  { %1110 = vmatpush1.bf16.msra.mxu0 %v1982_v21  ;;  %1151 = vmatpush1.bf16.msra.mxu1 %v1989_v22  ;;  %v2700_v22 = vld [vmem:[#allocation11_spill] sm:$0xff] }
 0x3f0   :  { %1111 = vmatprep.subr.bf16.mxu0 %v1996_v23  ;;  %1152 = vmatprep.subr.bf16.mxu1 %v2001_v24 }
 0x3f3   :  { %1112 = vmatpush1.bf16.msra.mxu0 %v2008_v25  ;;  %1153 = vmatpush1.bf16.msra.mxu1 %v2015_v26  ;;  %v2701_v26 = vld [vmem:[#allocation10_spill] sm:$0xff] }
 0x3f4   :  { %1113 = vmatprep.subr.bf16.mxu0 %v2022_v27  ;;  %1154 = vmatprep.subr.bf16.mxu1 %v2027_v28 }
 0x3f7   :  { %1114 = vmatpush1.bf16.msra.mxu0 %v2037_v30  ;;  %1155 = vmatpush1.bf16.msra.mxu1 %v2042_v31 }
 0x3f8   :  { %1115 = vmatprep.subr.bf16.mxu0 %v2049_v32  ;;  %1156 = vmatprep.subr.bf16.mxu1 %v2056_v33 }
 0x3fb   :  { %1116 = vmatpush1.bf16.msra.mxu0 %v2063_v34  ;;  %1157 = vmatpush1.bf16.msra.mxu1 %v2068_v35 }
 0x3fc   :  { %1117 = vmatprep.subr.bf16.mxu0 %v2075_v36  ;;  %1158 = vmatprep.subr.bf16.mxu1 %v2082_v37 }
 0x3ff   :  { %1118 = vmatpush1.bf16.msra.mxu0 %v2094_v39  ;;  %1159 = vmatpush1.bf16.msra.mxu1 %v2099_v40 }
 0x400   :  { %1119 = vmatprep.subr.bf16.mxu0 %v2106_v41  ;;  %1160 = vmatprep.subr.bf16.mxu1 %v2111_v42 }
 0x403   :  { %1120 = vmatpush1.bf16.msra.mxu0 %v2120_v43  ;;  %1161 = vmatpush1.bf16.msra.mxu1 %v2125_v44 }
 0x404   :  { %1221 = vmatprep.subr.bf16.mxu0 %v2424_v12  ;;  %1262 = vmatprep.subr.bf16.mxu1 %v2430_v13 }
 0x4a6   :  { %v1023_v14 = vpop.f32.mrf.mxu0  ;;  %v1064_v15 = vpop.f32.mrf.mxu1 }
 0x4a7   :  { %v1071_v17 = vadd.f32 %v1023_v14, %v2699_v16  ;;  %v1073_v27 = vadd.f32 %v1064_v15, %v2701_v26  ;;  %v2512_v14 = vld [vmem:[%s2668_s2 + $0x8c] ss:$16 sps:$4 sm:$0xff]   ;;  %v2518_v15 = vld [vmem:[%s2668_s2 + $0x80] ss:$16 sps:$4 sm:$0xff]   ;;  %v2524_v16 = vld [vmem:[%s2668_s2 + $0x88] ss:$16 sps:$4 sm:$0xff]  }
 0x4a8   :  { %v1025_v18 = vpop.f32.mrf.mxu0  ;;  %v1066_v20 = vpop.f32.mrf.mxu1 }
 0x4a9   :  { %v1075_v21 = vmul.f32 0.5, %v1071_v17  ;;  %v1072_v23 = vadd.f32 %v1025_v18, %v2700_v22  ;;  %v1074_v53 = vadd.f32 %v1066_v20, %v2702_v47  ;;  %v2530_v17 = vld [vmem:[%s2668_s2 + $0x64] ss:$16 sps:$4 sm:$0xff]   ;;  %v2536_v18 = vld [vmem:[%s2668_s2 + $0x6c] ss:$16 sps:$4 sm:$0xff]  }
 0x4aa   :  { %v1027_v24 = vpop.f32.mrf.mxu0  ;;  %v1068_v25 = vpop.f32.mrf.mxu1 }
 0x4ab   :  { %1776 = vtanh.f32 %v1075_v21  ;;  %v1079_v28 = vmul.f32 0.5, %v1072_v23  ;;  %v1084_v54 = vmul.f32 0.5, %v1074_v53 }
 0x4ac   :  { %v1028_v9 = vpop.f32.mrf.mxu0  ;;  %v1069_v61 = vpop.f32.mrf.mxu1 }
 0x4ad   :  { %1778 = vtanh.f32 %v1079_v28 }
 0x4ae   :  { %1780 = vtanh.f32 %v1073_v27 }
 0x4af   :  { %1782 = vtanh.f32 %v1084_v54 }
 0x4b8   :  { %v1777_v55 = vpop.eup %1776 }
 0x4b9   :  { %v1077_v1 = vmul.f32 0.5, %v1777_v55 }
 0x4ba   :  { %v1779_v63 = vpop.eup %1778 }
 0x4bb   :  { %v1078_v48 = vadd.f32 0.5, %v1077_v1  ;;  %v1081_v57 = vmul.f32 0.5, %v1779_v63  ;;  %v1781_v59 = vpop.eup %1780 }
 0x4bc   :  { %v1783_v19 = vpop.eup %1782 }
 0x4bd   :  { %v1082_v4 = vadd.f32 0.5, %v1081_v57  ;;  %v1089_v8 = vmul.f32 %v1781_v59, %v1078_v48  ;;  %v1086_v52 = vmul.f32 0.5, %v1783_v19  ;;  %v1835_v59 = vld [vmem:[%s2668_s2 + $0x68] ss:$16 sps:$4 sm:$0xff]   ;;  %v1840_v19 = vld [vmem:[%s2668_s2 + $0x24] ss:$16 sps:$4 sm:$0xff]  }
 0x4bf   :  { %v1088_v10 = vmul.f32 %v1082_v4, %v2386_v45  ;;  %v1087_v51 = vadd.f32 0.5, %v1086_v52  ;;  %v2470_v45 = vld [vmem:[%s2668_s2 + $0xc0] ss:$16 sps:$4 sm:$0xff]   ;;  %v1836_v4 = vld [vmem:[%s2668_s2 + $0x44] ss:$16 sps:$4 sm:$0xff]  }
 0x4c0   :  { %v1841_v52 = vld [vmem:[%s2668_s2 + $0x2c] ss:$16 sps:$4 sm:$0xff]  }
 0x4c1   :  { %v2438_v11 = vadd.f32 %v1089_v8, %v1088_v10  ;;  %v1837_v8 = vld [vmem:[%s2668_s2 + $0x4c] ss:$16 sps:$4 sm:$0xff]   ;;  %v1838_v10 = vld [vmem:[%s2668_s2 + $0x40] ss:$16 sps:$4 sm:$0xff]  }
 0x4c3   :  { %1784 = vtanh.f32 %v2438_v11 }
 0x4d0   :  { %v1785_v38 = vpop.eup %1784 }
 0x4d1   :  { %v1092_v58 = vmul.f32 %v1785_v38, %v1087_v51  ;;  %v1842_v51 = vld [vmem:[%s2668_s2 + $0x20] ss:$16 sps:$4 sm:$0xff]   ;;  %v1843_v38 = vld [vmem:[%s2668_s2 + $0x28] ss:$16 sps:$4 sm:$0xff]  }
 0x4d3   :  { %v1104_v2 = vpack.c.bf16 %v1092_v58, %v1092_v58  ;;  %v1844_v58 = vld [vmem:[%s2668_s2 + $0x4] ss:$16 sps:$4 sm:$0xff]  }
 0x4d5   :  { %1138 = vmatmul.mubr.bf16.vlgmr.msra.gmra.mxu0 %v1104_v2  ;;  %1179 = vmatmul.mubr.bf16.vlgmr.msra.gmra.mxu1 %v1104_v2  ;;  %v1845_v2 = vld [vmem:[%s2668_s2 + $0xc] ss:$16 sps:$4 sm:$0xff]  }
 0x4d6   :  { %1222 = vmatpush1.bf16.msra.mxu0 %v2444_v6  ;;  %1263 = vmatpush1.bf16.msra.mxu1 %v2450_v5 }
 0x4d7   :  { %1223 = vmatprep.subr.bf16.mxu0 %v2456_v56  ;;  %1264 = vmatprep.subr.bf16.mxu1 %v2462_v62 }
 0x4d8   :  { %1253 = vmatprep.mubr.bf16.mxu0 %v2694_v60  ;;  %1294 = vmatprep.mubr.bf16.mxu1 %v2694_v60 }
 0x4da   :  { %1224 = vmatpush1.bf16.msra.mxu0 %v2470_v45  ;;  %1265 = vmatpush1.bf16.msra.mxu1 %v2476_v3 }
 0x4db   :  { %1225 = vmatprep.subr.bf16.mxu0 %v2482_v29  ;;  %1266 = vmatprep.subr.bf16.mxu1 %v2488_v0 }
 0x4de   :  { %1226 = vmatpush1.bf16.msra.mxu0 %v2494_v50  ;;  %1267 = vmatpush1.bf16.msra.mxu1 %v2500_v49 }
 0x4df   :  { %1227 = vmatprep.subr.bf16.mxu0 %v2506_v46  ;;  %1268 = vmatprep.subr.bf16.mxu1 %v2512_v14 }
 0x4e2   :  { %1228 = vmatpush1.bf16.msra.mxu0 %v2518_v15  ;;  %1269 = vmatpush1.bf16.msra.mxu1 %v2524_v16 }
 0x4e3   :  { %1229 = vmatprep.subr.bf16.mxu0 %v2530_v17  ;;  %1270 = vmatprep.subr.bf16.mxu1 %v2536_v18 }
 0x4e6   :  { %1230 = vmatpush1.bf16.msra.mxu0 %v2037_v30  ;;  %1271 = vmatpush1.bf16.msra.mxu1 %v2042_v31 }
 0x4e7   :  { %1231 = vmatprep.subr.bf16.mxu0 %v2049_v32  ;;  %1272 = vmatprep.subr.bf16.mxu1 %v2056_v33  ;;  %v2703_v32 = vld [vmem:[#allocation13_spill] sm:$0xff] }
 0x4ea   :  { %1232 = vmatpush1.bf16.msra.mxu0 %v2063_v34  ;;  %1273 = vmatpush1.bf16.msra.mxu1 %v2068_v35 }
 0x4eb   :  { %1233 = vmatprep.subr.bf16.mxu0 %v2075_v36  ;;  %1274 = vmatprep.subr.bf16.mxu1 %v2082_v37  ;;  %v2704_v37 = vld [vmem:[#allocation15_spill] sm:$0xff] }
 0x4ee   :  { %1234 = vmatpush1.bf16.msra.mxu0 %v2094_v39  ;;  %1275 = vmatpush1.bf16.msra.mxu1 %v2099_v40 }
 0x4ef   :  { %1235 = vmatprep.subr.bf16.mxu0 %v2106_v41  ;;  %1276 = vmatprep.subr.bf16.mxu1 %v2111_v42  ;;  %v2705_v42 = vld [vmem:[#allocation14_spill] sm:$0xff] }
 0x4f2   :  { %1236 = vmatpush1.bf16.msra.mxu0 %v2120_v43  ;;  %1277 = vmatpush1.bf16.msra.mxu1 %v2125_v44 }
 0x4f3   :  { %1337 = vmatprep.subr.bf16.mxu0 %v2424_v12  ;;  %1378 = vmatprep.subr.bf16.mxu1 %v2430_v13  ;;  %v2706_v12 = vld [vmem:[#allocation16_spill] sm:$0xff] }
 0x595   :  { %v1139_v30 = vpop.f32.mrf.mxu0  ;;  %v1180_v31 = vpop.f32.mrf.mxu1 }
 0x596   :  { %v1187_v33 = vadd.f32 %v1139_v30, %v2703_v32  ;;  %v1189_v43 = vadd.f32 %v1180_v31, %v2705_v42  ;;  %v2710_v32 = vld [vmem:[#allocation20_spill] sm:$0xff] }
 0x597   :  { %v1141_v34 = vpop.f32.mrf.mxu0  ;;  %v1182_v35 = vpop.f32.mrf.mxu1 }
 0x598   :  { %v1191_v36 = vmul.f32 0.5, %v1187_v33  ;;  %v1188_v39 = vadd.f32 %v1141_v34, %v2704_v37  ;;  %v1190_v13 = vadd.f32 %v1182_v35, %v2706_v12 }
 0x599   :  { %v1143_v40 = vpop.f32.mrf.mxu0  ;;  %v1184_v41 = vpop.f32.mrf.mxu1 }
 0x59a   :  { %1786 = vtanh.f32 %v1191_v36  ;;  %v1195_v20 = vmul.f32 0.5, %v1188_v39  ;;  %v1200_v22 = vmul.f32 0.5, %v1190_v13 }
 0x59b   :  { %v1144_v44 = vpop.f32.mrf.mxu0  ;;  %v1185_v21 = vpop.f32.mrf.mxu1 }
 0x59c   :  { %1788 = vtanh.f32 %v1195_v20 }
 0x59d   :  { %1790 = vtanh.f32 %v1189_v43 }
 0x59e   :  { %1792 = vtanh.f32 %v1200_v22 }
 0x5a7   :  { %v1787_v23 = vpop.eup %1786 }
 0x5a8   :  { %v1193_v24 = vmul.f32 0.5, %v1787_v23 }
 0x5a9   :  { %v1789_v25 = vpop.eup %1788 }
 0x5aa   :  { %v1194_v26 = vadd.f32 0.5, %v1193_v24  ;;  %v1197_v27 = vmul.f32 0.5, %v1789_v25  ;;  %v1791_v28 = vpop.eup %1790  ;;  %v1728_v25 = vld [vmem:[%s2670_s4 + $0x38] sm:$0xff]  }
 0x5ab   :  { %v1793_v54 = vpop.eup %1792 }
 0x5ac   :  { %v1198_v9 = vadd.f32 0.5, %v1197_v27  ;;  %v1205_v61 = vmul.f32 %v1791_v28, %v1194_v26  ;;  %v1202_v55 = vmul.f32 0.5, %v1793_v54  ;;  %v1850_v26 = vmov 0.0   ;;  %v1729_v27 = vld [vmem:[%s2670_s4 + $0x30] sm:$0xff]   ;;  %v1730_v28 = vld [vmem:[%s2670_s4 + $0x28] sm:$0xff]   ;;  %v1735_v54 = vld [vmem:[%s2670_s4] sm:$0xff]  }
 0x5ae   :  { %v1204_v47 = vmul.f32 %v1198_v9, %v2438_v11  ;;  %v1203_v1 = vadd.f32 0.5, %v1202_v55  ;;  %v1839_v11 = vld [vmem:[%s2668_s2 + $0x48] ss:$16 sps:$4 sm:$0xff]   ;;  %v1731_v9 = vld [vmem:[%s2670_s4 + $0x20] sm:$0xff]  }
 0x5b0   :  { %v2560_v53 = vadd.f32 %v1205_v61, %v1204_v47  ;;  %v1732_v61 = vld [vmem:[%s2670_s4 + $0x18] sm:$0xff]   ;;  %v1733_v47 = vld [vmem:[%s2670_s4 + $0x10] sm:$0xff]  }
 0x5b2   :  { %1794 = vtanh.f32 %v2560_v53 }
 0x5bf   :  { %v1795_v63 = vpop.eup %1794 }
 0x5c0   :  { %v1208_v48 = vmul.f32 %v1795_v63, %v1203_v1  ;;  %v2711_v63 = vld [vmem:[#allocation21_spill] sm:$0xff] }
 0x5c2   :  { %v1220_v57 = vpack.c.bf16 %v1208_v48, %v1208_v48 }
 0x5c4   :  { %1254 = vmatmul.mubr.bf16.vlgmr.msra.gmra.mxu0 %v1220_v57  ;;  %1295 = vmatmul.mubr.bf16.vlgmr.msra.gmra.mxu1 %v1220_v57 }
 0x5c5   :  { %1338 = vmatpush1.bf16.msra.mxu0 %v2444_v6  ;;  %1379 = vmatpush1.bf16.msra.mxu1 %v2450_v5  ;;  %v1846_v6 = vld [vmem:[%s2668_s2] ss:$16 sps:$4 sm:$0xff]   ;;  %v1847_v5 = vld [vmem:[%s2668_s2 + $0x8] ss:$16 sps:$4 sm:$0xff]  }
 0x5c6   :  { %1339 = vmatprep.subr.bf16.mxu0 %v2456_v56  ;;  %1380 = vmatprep.subr.bf16.mxu1 %v2462_v62 }
 0x5c7   :  { %1369 = vmatprep.mubr.bf16.mxu0 %v2694_v60  ;;  %1410 = vmatprep.mubr.bf16.mxu1 %v2694_v60  ;;  %v1834_v60 = vld [vmem:[%s2668_s2 + $0x60] ss:$16 sps:$4 sm:$0xff]  }
 0x5c9   :  { %1340 = vmatpush1.bf16.msra.mxu0 %v2470_v45  ;;  %1381 = vmatpush1.bf16.msra.mxu1 %v2476_v3  ;;  %v2707_v45 = vld [vmem:[#allocation17_spill] sm:$0xff] }
 0x5ca   :  { %1341 = vmatprep.subr.bf16.mxu0 %v2482_v29  ;;  %1382 = vmatprep.subr.bf16.mxu1 %v2488_v0 }
 0x5cd   :  { %1342 = vmatpush1.bf16.msra.mxu0 %v2494_v50  ;;  %1383 = vmatpush1.bf16.msra.mxu1 %v2500_v49  ;;  %v2708_v49 = vld [vmem:[#allocation19_spill] sm:$0xff] }
 0x5ce   :  { %1343 = vmatprep.subr.bf16.mxu0 %v2506_v46  ;;  %1384 = vmatprep.subr.bf16.mxu1 %v2512_v14 }
 0x5d1   :  { %1344 = vmatpush1.bf16.msra.mxu0 %v2518_v15  ;;  %1385 = vmatpush1.bf16.msra.mxu1 %v2524_v16  ;;  %v2709_v16 = vld [vmem:[#allocation18_spill] sm:$0xff] }
 0x5d2   :  { %1345 = vmatprep.subr.bf16.mxu0 %v2530_v17  ;;  %1386 = vmatprep.subr.bf16.mxu1 %v2536_v18 }
 0x5d5   :  { %1346 = vmatpush1.bf16.msra.mxu0 %v1834_v60  ;;  %1387 = vmatpush1.bf16.msra.mxu1 %v1835_v59 }
 0x5d6   :  { %1347 = vmatprep.subr.bf16.mxu0 %v1836_v4  ;;  %1388 = vmatprep.subr.bf16.mxu1 %v1837_v8 }
 0x5d9   :  { %1348 = vmatpush1.bf16.msra.mxu0 %v1838_v10  ;;  %1389 = vmatpush1.bf16.msra.mxu1 %v1839_v11  ;;  %v2712_v11 = vld [vmem:[#allocation22_spill] sm:$0xff] }
 0x5da   :  { %1349 = vmatprep.subr.bf16.mxu0 %v1840_v19  ;;  %1390 = vmatprep.subr.bf16.mxu1 %v1841_v52 }
 0x5dd   :  { %1350 = vmatpush1.bf16.msra.mxu0 %v1842_v51  ;;  %1391 = vmatpush1.bf16.msra.mxu1 %v1843_v38 }
 0x5de   :  { %1351 = vmatprep.subr.bf16.mxu0 %v1844_v58  ;;  %1392 = vmatprep.subr.bf16.mxu1 %v1845_v2  ;;  %v2713_v58 = vld [vmem:[#allocation23_spill] sm:$0xff] }
 0x5e1   :  { %1352 = vmatpush1.bf16.msra.mxu0 %v1846_v6  ;;  %1393 = vmatpush1.bf16.msra.mxu1 %v1847_v5 }
 0x5e2   :  { %1640 = vmatprep.subr.bf16.mxu0 %v1850_v26 }
 0x684   :  { %v1255_v56 = vpop.f32.mrf.mxu0  ;;  %v1296_v62 = vpop.f32.mrf.mxu1 }
 0x685   :  { %v1303_v3 = vadd.f32 %v1255_v56, %v2707_v45  ;;  %v1305_v17 = vadd.f32 %v1296_v62, %v2709_v16 }
 0x686   :  { %v1257_v29 = vpop.f32.mrf.mxu0  ;;  %v1298_v0 = vpop.f32.mrf.mxu1 }
 0x687   :  { %v1307_v50 = vmul.f32 0.5, %v1303_v3  ;;  %v1304_v46 = vadd.f32 %v1257_v29, %v2708_v49  ;;  %v1306_v33 = vadd.f32 %v1298_v0, %v2710_v32 }
 0x688   :  { %v1259_v14 = vpop.f32.mrf.mxu0  ;;  %v1300_v15 = vpop.f32.mrf.mxu1 }
 0x689   :  { %1796 = vtanh.f32 %v1307_v50  ;;  %v1311_v18 = vmul.f32 0.5, %v1304_v46  ;;  %v1316_v34 = vmul.f32 0.5, %v1306_v33 }
 0x68a   :  { %v1260_v30 = vpop.f32.mrf.mxu0  ;;  %v1301_v31 = vpop.f32.mrf.mxu1 }
 0x68b   :  { %1798 = vtanh.f32 %v1311_v18  ;;  %v1622_v30 = vld [vmem:[%s2671_s5] ss:$0 sm:$0xff] }
 0x68c   :  { %1800 = vtanh.f32 %v1305_v17 }
 0x68d   :  { %1802 = vtanh.f32 %v1316_v34 }
 0x696   :  { %v1797_v35 = vpop.eup %1796 }
 0x697   :  { %v1309_v36 = vmul.f32 0.5, %v1797_v35 }
 0x698   :  { %v1799_v37 = vpop.eup %1798 }
 0x699   :  { %v1310_v39 = vadd.f32 0.5, %v1309_v36  ;;  %v1313_v40 = vmul.f32 0.5, %v1799_v37  ;;  %v1801_v41 = vpop.eup %1800 }
 0x69a   :  { %v1803_v21 = vpop.eup %1802 }
 0x69b   :  { %v1314_v42 = vadd.f32 0.5, %v1313_v40  ;;  %v1321_v43 = vmul.f32 %v1801_v41, %v1310_v39  ;;  %v1318_v12 = vmul.f32 0.5, %v1803_v21 }
 0x69d   :  { %v1320_v20 = vmul.f32 %v1314_v42, %v2560_v53  ;;  %v1319_v13 = vadd.f32 0.5, %v1318_v12  ;;  %v1734_v53 = vld [vmem:[%s2670_s4 + $0x8] sm:$0xff]  }
 0x69f   :  { %v2628_v44 = vadd.f32 %v1321_v43, %v1320_v20 }
 0x6a1   :  { %1804 = vtanh.f32 %v2628_v44 }
 0x6ae   :  { %v1805_v22 = vpop.eup %1804 }
 0x6af   :  { %v1324_v23 = vmul.f32 %v1805_v22, %v1319_v13 }
 0x6b1   :  { %v1336_v24 = vpack.c.bf16 %v1324_v23, %v1324_v23 }
 0x6b3   :  { %1370 = vmatmul.mubr.bf16.vlgmr.msra.gmra.mxu0 %v1336_v24  ;;  %1411 = vmatmul.mubr.bf16.vlgmr.msra.gmra.mxu1 %v1336_v24 }
 0x6b4   :  { %1641 = vmatpush3.bf16.msra.mxu0 %v1728_v25  ;;  %1656 = vmatprep.mubr.msk.bf16.mxu0 %vm1851_vm1, %v1850_v26 }
 0x6b5   :  { %1642 = vmatprep.subr.bf16.mxu0 %v1850_v26 }
 0x6b8   :  { %1643 = vmatpush3.bf16.msra.mxu0 %v1729_v27 }
 0x6b9   :  { %1644 = vmatprep.subr.bf16.mxu0 %v1850_v26 }
 0x6bc   :  { %1645 = vmatpush3.bf16.msra.mxu0 %v1730_v28 }
 0x6bd   :  { %1646 = vmatprep.subr.bf16.mxu0 %v1850_v26 }
 0x6c0   :  { %1647 = vmatpush3.bf16.msra.mxu0 %v1731_v9 }
 0x6c1   :  { %1648 = vmatprep.subr.bf16.mxu0 %v1850_v26 }
 0x6c4   :  { %1649 = vmatpush3.bf16.msra.mxu0 %v1732_v61 }
 0x6c5   :  { %1650 = vmatprep.subr.bf16.mxu0 %v1850_v26 }
 0x6c8   :  { %1651 = vmatpush3.bf16.msra.mxu0 %v1733_v47 }
 0x6c9   :  { %1652 = vmatprep.subr.bf16.mxu0 %v1850_v26 }
 0x6cc   :  { %1653 = vmatpush3.bf16.msra.mxu0 %v1734_v53 }
 0x6cd   :  { %1654 = vmatprep.subr.bf16.mxu0 %v1850_v26 }
 0x6d0   :  { %1655 = vmatpush3.bf16.msra.mxu0 %v1735_v54 }
 0x773   :  { %v1371_v55 = vpop.f32.mrf.mxu0  ;;  %v1412_v1 = vpop.f32.mrf.mxu1 }
 0x774   :  { %v1419_v48 = vadd.f32 %v1371_v55, %v2711_v63  ;;  %v1421_v19 = vadd.f32 %v1412_v1, %v2712_v11 }
 0x775   :  { %v1373_v57 = vpop.f32.mrf.mxu0  ;;  %v1414_v60 = vpop.f32.mrf.mxu1 }
 0x776   :  { %v1423_v59 = vmul.f32 0.5, %v1419_v48  ;;  %v1420_v4 = vadd.f32 %v1373_v57, %v2250_v7  ;;  %v1422_v2 = vadd.f32 %v1414_v60, %v2713_v58 }
 0x777   :  { %v1375_v8 = vpop.f32.mrf.mxu0  ;;  %v1416_v10 = vpop.f32.mrf.mxu1 }
 0x778   :  { %1806 = vtanh.f32 %v1423_v59  ;;  %v1427_v52 = vmul.f32 0.5, %v1420_v4  ;;  %v1432_v6 = vmul.f32 0.5, %v1422_v2 }
 0x779   :  { %v1376_v51 = vpop.f32.mrf.mxu0  ;;  %v1417_v38 = vpop.f32.mrf.mxu1 }
 0x77a   :  { %1808 = vtanh.f32 %v1427_v52 }
 0x77b   :  { %1810 = vtanh.f32 %v1421_v19 }
 0x77c   :  { %1812 = vtanh.f32 %v1432_v6 }
 0x785   :  { %v1807_v5 = vpop.eup %1806 }
 0x786   :  { %v1425_v56 = vmul.f32 0.5, %v1807_v5 }
 0x787   :  { %v1809_v62 = vpop.eup %1808 }
 0x788   :  { %v1426_v45 = vadd.f32 0.5, %v1425_v56  ;;  %v1429_v3 = vmul.f32 0.5, %v1809_v62  ;;  %v1811_v7 = vpop.eup %1810 }
 0x789   :  { %v1813_v46 = vpop.eup %1812 }
 0x78a   :  { %v1430_v29 = vadd.f32 0.5, %v1429_v3  ;;  %v1437_v0 = vmul.f32 %v1811_v7, %v1426_v45  ;;  %v1434_v14 = vmul.f32 0.5, %v1813_v46 }
 0x78c   :  { %v1436_v50 = vmul.f32 %v1430_v29, %v2628_v44  ;;  %v1435_v15 = vadd.f32 0.5, %v1434_v14 }
 0x78e   :  { %v1438_v49 = vadd.f32 %v1437_v0, %v1436_v50 }
 0x790   :  { %1814 = vtanh.f32 %v1438_v49 }
 0x79d   :  { %v1815_v16 = vpop.eup %1814 }
 0x79e   :  { %v1440_v17 = vmul.f32 %v1815_v16, %v1435_v15 }
 0x7a0   :  { %v1446_v18 = vpack.c.bf16 %v1440_v17, %v1440_v17 }
 0x7a2   :  { %1657 = vmatmul.mubr.bf16.vlgmr.msra.gmra.mxu0 %v1446_v18 }
 0x862   :  { %v1552_v31 = vpop.f32.mrf.mxu0 }
 0x863   :  { %v1553_v32 = vadd.f32 %v1622_v30, %v1552_v31 }
 0x864   :  { %v1658_v33 = vpop.f32.mrf.mxu0 }
 0x865   :  { %1558 = vst [vmem:[%s2672_s6] sm:$0xff] %v1553_v32 }
 0x866   :  { %v1555_v34 = vpop.f32.mrf.mxu0 }
 0x868   :  { %v1659_v35 = vpop.f32.mrf.mxu0 }

</bundles_post_ra>
